<compile_context>
chip_gen: v5e
topology: v5e:2x2
jax: 0.10.0
libtpu: 0.0.40
codegen_flags: <defaults>
</compile_context>

<pallas_src>
import jax
import jax.numpy as jnp
from jax.experimental import pallas as pl
from jax.experimental.pallas import tpu as pltpu

HIDDEN = 32
NUM_RATINGS = 5                  # W_r has NUM_RATINGS + 1 slices
NUM_USERS, NUM_ITEMS = 50, 60
NUM_USER_GENDERS, NUM_ITEM_GENRES = 2, 4
NUM_LAYERS = 2
# (Nu_src, Ni_src, Nu_dst, Ni_dst) per DGL block; dst nodes are a prefix of src nodes
BLOCK_SIZES = [(12, 16, 8, 10), (8, 10, 6, 8)]


# ------------------------------ Pallas kernel -------------------------------

def _gcmc_fused_kernel(feat0_ref, a_ref, wrt_ref, wcat_ref, wb_ref, wv_ref, out_ref):
    f32 = jnp.float32
    npad = feat0_ref.shape[0] // 2          # uniform padded node count (16)
    d = feat0_ref.shape[1]                  # HIDDEN
    num_r = wrt_ref.shape[2] // d           # NUM_RATINGS + 1
    n_convs = a_ref.shape[0]                # 2 per layer

    user_h = feat0_ref[:npad, :]            # (npad, d)
    item_h = feat0_ref[npad:, :]            # (npad, d)

    def conv(idx, src_h, dst_h):
        # (1) all-rating messages in one lane-dense matmul:
        #     msgs[s, r*d + j] = (W_r[r] @ src_h[s])[j]
        msgs = jnp.dot(src_h, wrt_ref[idx], preferred_element_type=f32)       # (npad, R*d)
        # (2) one matmul against the inv-degree-scaled, row-stacked adjacency
        #     slab; the mean-aggregated messages are the R diagonal blocks.
        q = jnp.dot(a_ref[idx], msgs, preferred_element_type=f32)             # (R*npad, R*d)
        agg = q[0:npad, 0:d]
        for r in range(1, num_r):
            agg = agg + q[r * npad:(r + 1) * npad, r * d:(r + 1) * d]         # (npad, d)
        # relu(W @ cat([h_dst, mean_in_edges(m)]))  -- W pre-transposed, split
        w_cat = wcat_ref[idx]                                                 # (2d, d)
        out = (jnp.dot(dst_h, w_cat[:d], preferred_element_type=f32)
               + jnp.dot(agg, w_cat[d:], preferred_element_type=f32)
               + wb_ref[idx])
        return jnp.maximum(out, 0.0)

    # layers (both relations of a layer consume the layer-input features)
    for layer in range(n_convs // 2):
        new_user = conv(2 * layer, item_h, user_h)
        new_item = conv(2 * layer + 1, user_h, item_h)
        user_h, item_h = new_user, new_item

    # final projections W (users) / V (items) -- the only HBM stores
    wv = wv_ref[...]                                   # (d+1, 2d): [W^T|V^T ; W_b|V_b]
    w_t, v_t = wv[:d, :d], wv[:d, d:]
    w_b, v_b = wv[d:d + 1, :d], wv[d:d + 1, d:]
    out_ref[:npad, :] = (jnp.dot(user_h, w_t, preferred_element_type=f32)
                         + w_b).astype(out_ref.dtype)
    out_ref[npad:, :] = (jnp.dot(item_h, v_t, preferred_element_type=f32)
                         + v_b).astype(out_ref.dtype)


def gcmc_rating2_forward_pallas(params, blocks, user_nids, item_nids, genders, genres):
    """Whole GCMCRating2.forward as a single grid-less pallas_call."""
    assert len(blocks) == NUM_LAYERS
    D = HIDDEN
    R = NUM_RATINGS + 1
    # uniform padded node count: every conv's Nd / Ns is padded to this
    all_counts = [c for bs in BLOCK_SIZES for c in bs]
    npad = -(-max(all_counts) // 8) * 8

    # Embedding gathers and the tiny I_genres linear are input glue done once
    # in the wrapper (no clean in-kernel gather at this scale).
    user_h0 = params["user_emb"][user_nids] + params["U_gender"][genders]
    item_h0 = (params["item_emb"][item_nids]
               + genres @ params["I_genres_W"].T + params["I_genres_b"])

    def pad_rows(x):
        return jnp.zeros((npad, D), jnp.float32).at[:x.shape[0], :].set(x)

    feat0 = jnp.concatenate([pad_rows(user_h0), pad_rows(item_h0)], axis=0)   # (2*npad, D)

    def prep_a(A):
        # Fold the mean (inverse in-degree) into A and zero-pad to (R, npad, npad),
        # then stack the rating slices along rows: row r*npad + d.
        # NOTE: max(deg, 1) guards zero-in-degree dst rows (incl. padding); the
        # pure-JAX ref divides by the raw degree, so they only agree when every
        # real dst node has >= 1 in-edge (guaranteed by make_rating_adj).
        R_, Nd, Ns = A.shape
        inv = 1.0 / jnp.maximum(jnp.sum(A, axis=(0, 2)), 1.0)                 # (Nd,)
        A_scaled = A * inv[None, :, None]
        return (jnp.zeros((R_, npad, npad), jnp.float32)
                .at[:, :Nd, :Ns].set(A_scaled)
                .reshape(R_ * npad, npad))

    def prep_wrt(W_r):
        # hstack_r(W_r[r]^T): wrt[k, r*D + j] = W_r[r, j, k]
        return jnp.transpose(W_r, (2, 0, 1)).reshape(D, R * D)

    a_list, wrt_list, wcat_list, wb_list = [], [], [], []
    for block, lp in zip(blocks, params["layers"]):
        for A, rel in ((block["A_ui"], "watchedby"), (block["A_iu"], "watched")):
            a_list.append(prep_a(A))
            wrt_list.append(prep_wrt(lp[rel]["W_r"]))
            wcat_list.append(lp[rel]["W_W"].T)                  # (2D, D)
            wb_list.append(lp[rel]["W_b"].reshape(1, D))

    a_slab = jnp.stack(a_list)                                  # (4, R*npad, npad)
    wrt_slab = jnp.stack(wrt_list)                              # (4, D, R*D)
    wcat_slab = jnp.stack(wcat_list)                            # (4, 2D, D)
    wb_slab = jnp.stack(wb_list)                                # (4, 1, D)
    wv_slab = jnp.concatenate([
        jnp.concatenate([params["W_W"].T, params["V_W"].T], axis=1),            # (D, 2D)
        jnp.concatenate([params["W_b"], params["V_b"]]).reshape(1, 2 * D),      # (1, 2D)
    ], axis=0)                                                  # (D+1, 2D)

    vmem = pl.BlockSpec(memory_space=pltpu.MemorySpace.VMEM)
    out = pl.pallas_call(
        _gcmc_fused_kernel,
        out_shape=jax.ShapeDtypeStruct((2 * npad, D), jnp.float32),
        in_specs=[vmem] * 6,
        out_specs=vmem,
    )(feat0, a_slab, wrt_slab, wcat_slab, wb_slab, wv_slab)

    nu_out = blocks[-1]["A_ui"].shape[1]
    ni_out = blocks[-1]["A_iu"].shape[1]
    return out[:nu_out, :], out[npad:npad + ni_out, :]


# --------------------------- params / graph data ----------------------------

def init_params(key):
    keys = iter(jax.random.split(key, 64))

    def nrm(shape, scale=0.1):
        return (scale * jax.random.normal(next(keys), shape)).astype(jnp.float32)

    params = dict(
        user_emb=nrm((NUM_USERS, HIDDEN)),
        item_emb=nrm((NUM_ITEMS, HIDDEN)),
        U_gender=nrm((NUM_USER_GENDERS, HIDDEN)),
        I_genres_W=nrm((HIDDEN, NUM_ITEM_GENRES)), I_genres_b=nrm((HIDDEN,)),
        W_W=nrm((HIDDEN, HIDDEN)), W_b=nrm((HIDDEN,)),
        V_W=nrm((HIDDEN, HIDDEN)), V_b=nrm((HIDDEN,)),
        layers=[],
    )
    for _ in range(NUM_LAYERS):
        layer = {}
        for rel in ("watchedby", "watched"):
            layer[rel] = dict(W_r=nrm((NUM_RATINGS + 1, HIDDEN, HIDDEN)),
                              W_W=nrm((HIDDEN, 2 * HIDDEN)),
                              W_b=nrm((HIDDEN,)))
        params["layers"].append(layer)
    return params


def make_rating_adj(key, R, Nd, Ns):
    k1, k2 = jax.random.split(key)
    ratings = jax.random.randint(k1, (Nd, Ns), 0, R)
    mask = jax.random.bernoulli(k2, 0.6, (Nd, Ns))
    mask = mask.at[:, 0].set(True)          # every dst node has >= 1 incoming edge
    return jax.nn.one_hot(ratings, R, axis=0) * mask[None, :, :].astype(jnp.float32)


def make_blocks(key):
    blocks = []
    for li, (nu_s, ni_s, nu_d, ni_d) in enumerate(BLOCK_SIZES):
        k1, k2 = jax.random.split(jax.random.fold_in(key, li))
        blocks.append(dict(
            # 'watchedby' relation: item (src) -> user (dst)
            A_ui=make_rating_adj(k1, NUM_RATINGS + 1, nu_d, ni_s),
            # 'watched'   relation: user (src) -> item (dst)
            A_iu=make_rating_adj(k2, NUM_RATINGS + 1, ni_d, nu_s),
        ))
    return blocks


# ------------------------------ pure-JAX refs -------------------------------

def gcmc_conv_ref(A, W_r, src_h, dst_h, W, b):
    T = jnp.einsum("rij,sj->rsi", W_r, src_h)           # (R, Ns, D) per-rating messages
    agg = jnp.einsum("rds,rsi->di", A, T)               # (Nd, D)
    deg = jnp.sum(A, axis=(0, 2))[:, None]
    h_neigh = agg / deg
    x = jnp.concatenate([dst_h, h_neigh], axis=1)
    return jnp.maximum(x @ W.T + b, 0.0)


def gcmc_rating2_forward_ref(params, blocks, user_nids, item_nids, genders, genres):
    user_h = params["user_emb"][user_nids] + params["U_gender"][genders]
    item_h = (params["item_emb"][item_nids]
              + genres @ params["I_genres_W"].T + params["I_genres_b"])
    for block, lp in zip(blocks, params["layers"]):
        dst_user = user_h[:block["A_ui"].shape[1]]
        dst_item = item_h[:block["A_iu"].shape[1]]
        new_user = gcmc_conv_ref(block["A_ui"], lp["watchedby"]["W_r"], item_h, dst_user,
                                 lp["watchedby"]["W_W"], lp["watchedby"]["W_b"])
        new_item = gcmc_conv_ref(block["A_iu"], lp["watched"]["W_r"], user_h, dst_item,
                                 lp["watched"]["W_W"], lp["watched"]["W_b"])
        user_h, item_h = new_user, new_item
    return (user_h @ params["W_W"].T + params["W_b"],
            item_h @ params["V_W"].T + params["V_b"])


# TODO(synk): compute_score (u_dot_v on a pair graph) is not part of forward(); not implemented.

if __name__ == "__main__":
    key = jax.random.PRNGKey(0)
    kp, kb, kn = jax.random.split(key, 3)
    params = init_params(kp)
    blocks = make_blocks(kb)

    k1, k2, k3, k4 = jax.random.split(kn, 4)
    nu_s0, ni_s0 = BLOCK_SIZES[0][0], BLOCK_SIZES[0][1]
    user_nids = jax.random.randint(k1, (nu_s0,), 0, NUM_USERS)
    item_nids = jax.random.randint(k2, (ni_s0,), 0, NUM_ITEMS)
    genders = jax.random.randint(k3, (nu_s0,), 0, NUM_USER_GENDERS)
    genres = jax.random.bernoulli(k4, 0.5, (ni_s0, NUM_ITEM_GENRES)).astype(jnp.float32)

    fwd = jax.jit(gcmc_rating2_forward_pallas)
    u_out, i_out = jax.block_until_ready(
        fwd(params, blocks, user_nids, item_nids, genders, genres))

    u_ref, i_ref = gcmc_rating2_forward_ref(params, blocks, user_nids, item_nids,
                                            genders, genres)
    assert u_out.shape == (BLOCK_SIZES[-1][2], HIDDEN)
    assert i_out.shape == (BLOCK_SIZES[-1][3], HIDDEN)
    assert jnp.allclose(u_out, u_ref, rtol=1e-3, atol=1e-3)
    assert jnp.allclose(i_out, i_ref, rtol=1e-3, atol=1e-3)
    print("KERNEL_OK")
</pallas_src>

<mosaic_0001>
module attributes {stable_mosaic.version = 11 : i64} {
  func.func @_gcmc_fused_kernel(%arg0: memref<32x32xf32, #tpu.memory_space<vmem>>, %arg1: memref<4x96x16xf32, #tpu.memory_space<vmem>>, %arg2: memref<4x32x192xf32, #tpu.memory_space<vmem>>, %arg3: memref<4x64x32xf32, #tpu.memory_space<vmem>>, %arg4: memref<4x1x32xf32, #tpu.memory_space<vmem>>, %arg5: memref<33x64xf32, #tpu.memory_space<vmem>>, %arg6: memref<32x32xf32, #tpu.memory_space<vmem>>) attributes {dimension_semantics = [], scalar_prefetch = 0 : i64, scratch_operands = 0 : i64, tpu.core_type = #tpu.core_type<tc>} {
    %c0 = arith.constant 0 : index
    %c0_0 = arith.constant 0 : index
    %0 = vector.load %arg0[%c0, %c0_0] : memref<32x32xf32, #tpu.memory_space<vmem>>, vector<16x32xf32>
    %c16 = arith.constant 16 : index
    %c0_1 = arith.constant 0 : index
    %1 = vector.load %arg0[%c16, %c0_1] : memref<32x32xf32, #tpu.memory_space<vmem>>, vector<16x32xf32>
    %c0_2 = arith.constant 0 : index
    %c0_3 = arith.constant 0 : index
    %c0_4 = arith.constant 0 : index
    %2 = vector.load %arg2[%c0_2, %c0_3, %c0_4] : memref<4x32x192xf32, #tpu.memory_space<vmem>>, vector<1x32x192xf32>
    %3 = vector.shape_cast %2 : vector<1x32x192xf32> to vector<32x192xf32>
    %cst = arith.constant dense<0.000000e+00> : vector<16x192xf32>
    %4 = tpu.matmul %1, %3, %cst {dimension_numbers = #tpu.dot_dimension_numbers<[1], [0], [0], [1], [0, 0, 1, 1], [], []>} : vector<16x32xf32>, vector<32x192xf32>, vector<16x192xf32> -> vector<16x192xf32>
    %c0_5 = arith.constant 0 : index
    %c0_6 = arith.constant 0 : index
    %c0_7 = arith.constant 0 : index
    %5 = vector.load %arg1[%c0_5, %c0_6, %c0_7] : memref<4x96x16xf32, #tpu.memory_space<vmem>>, vector<1x96x16xf32>
    %6 = vector.shape_cast %5 : vector<1x96x16xf32> to vector<96x16xf32>
    %cst_8 = arith.constant dense<0.000000e+00> : vector<96x192xf32>
    %7 = tpu.matmul %6, %4, %cst_8 {dimension_numbers = #tpu.dot_dimension_numbers<[1], [0], [0], [1], [0, 0, 1, 1], [], []>} : vector<96x16xf32>, vector<16x192xf32>, vector<96x192xf32> -> vector<96x192xf32>
    %8 = vector.extract_strided_slice %7 {offsets = [0, 0], sizes = [16, 32], strides = [1, 1]} : vector<96x192xf32> to vector<16x32xf32>
    %9 = vector.extract_strided_slice %7 {offsets = [16, 32], sizes = [16, 32], strides = [1, 1]} : vector<96x192xf32> to vector<16x32xf32>
    %10 = arith.addf %8, %9 : vector<16x32xf32>
    %11 = vector.extract_strided_slice %7 {offsets = [32, 64], sizes = [16, 32], strides = [1, 1]} : vector<96x192xf32> to vector<16x32xf32>
    %12 = arith.addf %10, %11 : vector<16x32xf32>
    %13 = vector.extract_strided_slice %7 {offsets = [48, 96], sizes = [16, 32], strides = [1, 1]} : vector<96x192xf32> to vector<16x32xf32>
    %14 = arith.addf %12, %13 : vector<16x32xf32>
    %15 = vector.extract_strided_slice %7 {offsets = [64, 128], sizes = [16, 32], strides = [1, 1]} : vector<96x192xf32> to vector<16x32xf32>
    %16 = arith.addf %14, %15 : vector<16x32xf32>
    %17 = vector.extract_strided_slice %7 {offsets = [80, 160], sizes = [16, 32], strides = [1, 1]} : vector<96x192xf32> to vector<16x32xf32>
    %18 = arith.addf %16, %17 : vector<16x32xf32>
    %c0_9 = arith.constant 0 : index
    %c0_10 = arith.constant 0 : index
    %c0_11 = arith.constant 0 : index
    %19 = vector.load %arg3[%c0_9, %c0_10, %c0_11] : memref<4x64x32xf32, #tpu.memory_space<vmem>>, vector<1x64x32xf32>
    %20 = vector.shape_cast %19 : vector<1x64x32xf32> to vector<64x32xf32>
    %21 = vector.extract_strided_slice %20 {offsets = [0, 0], sizes = [32, 32], strides = [1, 1]} : vector<64x32xf32> to vector<32x32xf32>
    %cst_12 = arith.constant dense<0.000000e+00> : vector<16x32xf32>
    %22 = tpu.matmul %0, %21, %cst_12 {dimension_numbers = #tpu.dot_dimension_numbers<[1], [0], [0], [1], [0, 0, 1, 1], [], []>} : vector<16x32xf32>, vector<32x32xf32>, vector<16x32xf32> -> vector<16x32xf32>
    %23 = vector.extract_strided_slice %20 {offsets = [32, 0], sizes = [32, 32], strides = [1, 1]} : vector<64x32xf32> to vector<32x32xf32>
    %cst_13 = arith.constant dense<0.000000e+00> : vector<16x32xf32>
    %24 = tpu.matmul %18, %23, %cst_13 {dimension_numbers = #tpu.dot_dimension_numbers<[1], [0], [0], [1], [0, 0, 1, 1], [], []>} : vector<16x32xf32>, vector<32x32xf32>, vector<16x32xf32> -> vector<16x32xf32>
    %25 = arith.addf %22, %24 : vector<16x32xf32>
    %c0_14 = arith.constant 0 : index
    %c0_15 = arith.constant 0 : index
    %c0_16 = arith.constant 0 : index
    %26 = vector.load %arg4[%c0_14, %c0_15, %c0_16] : memref<4x1x32xf32, #tpu.memory_space<vmem>>, vector<1x1x32xf32>
    %27 = vector.shape_cast %26 : vector<1x1x32xf32> to vector<1x32xf32>
    %28 = vector.broadcast %27 : vector<1x32xf32> to vector<16x32xf32>
    %29 = arith.addf %25, %28 : vector<16x32xf32>
    %cst_17 = arith.constant 0.000000e+00 : f32
    %30 = vector.broadcast %cst_17 : f32 to vector<16x32xf32>
    %31 = arith.maximumf %29, %30 : vector<16x32xf32>
    %c1 = arith.constant 1 : index
    %c0_18 = arith.constant 0 : index
    %c0_19 = arith.constant 0 : index
    %32 = vector.load %arg2[%c1, %c0_18, %c0_19] : memref<4x32x192xf32, #tpu.memory_space<vmem>>, vector<1x32x192xf32>
    %33 = vector.shape_cast %32 : vector<1x32x192xf32> to vector<32x192xf32>
    %cst_20 = arith.constant dense<0.000000e+00> : vector<16x192xf32>
    %34 = tpu.matmul %0, %33, %cst_20 {dimension_numbers = #tpu.dot_dimension_numbers<[1], [0], [0], [1], [0, 0, 1, 1], [], []>} : vector<16x32xf32>, vector<32x192xf32>, vector<16x192xf32> -> vector<16x192xf32>
    %c1_21 = arith.constant 1 : index
    %c0_22 = arith.constant 0 : index
    %c0_23 = arith.constant 0 : index
    %35 = vector.load %arg1[%c1_21, %c0_22, %c0_23] : memref<4x96x16xf32, #tpu.memory_space<vmem>>, vector<1x96x16xf32>
    %36 = vector.shape_cast %35 : vector<1x96x16xf32> to vector<96x16xf32>
    %cst_24 = arith.constant dense<0.000000e+00> : vector<96x192xf32>
    %37 = tpu.matmul %36, %34, %cst_24 {dimension_numbers = #tpu.dot_dimension_numbers<[1], [0], [0], [1], [0, 0, 1, 1], [], []>} : vector<96x16xf32>, vector<16x192xf32>, vector<96x192xf32> -> vector<96x192xf32>
    %38 = vector.extract_strided_slice %37 {offsets = [0, 0], sizes = [16, 32], strides = [1, 1]} : vector<96x192xf32> to vector<16x32xf32>
    %39 = vector.extract_strided_slice %37 {offsets = [16, 32], sizes = [16, 32], strides = [1, 1]} : vector<96x192xf32> to vector<16x32xf32>
    %40 = arith.addf %38, %39 : vector<16x32xf32>
    %41 = vector.extract_strided_slice %37 {offsets = [32, 64], sizes = [16, 32], strides = [1, 1]} : vector<96x192xf32> to vector<16x32xf32>
    %42 = arith.addf %40, %41 : vector<16x32xf32>
    %43 = vector.extract_strided_slice %37 {offsets = [48, 96], sizes = [16, 32], strides = [1, 1]} : vector<96x192xf32> to vector<16x32xf32>
    %44 = arith.addf %42, %43 : vector<16x32xf32>
    %45 = vector.extract_strided_slice %37 {offsets = [64, 128], sizes = [16, 32], strides = [1, 1]} : vector<96x192xf32> to vector<16x32xf32>
    %46 = arith.addf %44, %45 : vector<16x32xf32>
    %47 = vector.extract_strided_slice %37 {offsets = [80, 160], sizes = [16, 32], strides = [1, 1]} : vector<96x192xf32> to vector<16x32xf32>
    %48 = arith.addf %46, %47 : vector<16x32xf32>
    %c1_25 = arith.constant 1 : index
    %c0_26 = arith.constant 0 : index
    %c0_27 = arith.constant 0 : index
    %49 = vector.load %arg3[%c1_25, %c0_26, %c0_27] : memref<4x64x32xf32, #tpu.memory_space<vmem>>, vector<1x64x32xf32>
    %50 = vector.shape_cast %49 : vector<1x64x32xf32> to vector<64x32xf32>
    %51 = vector.extract_strided_slice %50 {offsets = [0, 0], sizes = [32, 32], strides = [1, 1]} : vector<64x32xf32> to vector<32x32xf32>
    %cst_28 = arith.constant dense<0.000000e+00> : vector<16x32xf32>
    %52 = tpu.matmul %1, %51, %cst_28 {dimension_numbers = #tpu.dot_dimension_numbers<[1], [0], [0], [1], [0, 0, 1, 1], [], []>} : vector<16x32xf32>, vector<32x32xf32>, vector<16x32xf32> -> vector<16x32xf32>
    %53 = vector.extract_strided_slice %50 {offsets = [32, 0], sizes = [32, 32], strides = [1, 1]} : vector<64x32xf32> to vector<32x32xf32>
    %cst_29 = arith.constant dense<0.000000e+00> : vector<16x32xf32>
    %54 = tpu.matmul %48, %53, %cst_29 {dimension_numbers = #tpu.dot_dimension_numbers<[1], [0], [0], [1], [0, 0, 1, 1], [], []>} : vector<16x32xf32>, vector<32x32xf32>, vector<16x32xf32> -> vector<16x32xf32>
    %55 = arith.addf %52, %54 : vector<16x32xf32>
    %c1_30 = arith.constant 1 : index
    %c0_31 = arith.constant 0 : index
    %c0_32 = arith.constant 0 : index
    %56 = vector.load %arg4[%c1_30, %c0_31, %c0_32] : memref<4x1x32xf32, #tpu.memory_space<vmem>>, vector<1x1x32xf32>
    %57 = vector.shape_cast %56 : vector<1x1x32xf32> to vector<1x32xf32>
    %58 = vector.broadcast %57 : vector<1x32xf32> to vector<16x32xf32>
    %59 = arith.addf %55, %58 : vector<16x32xf32>
    %cst_33 = arith.constant 0.000000e+00 : f32
    %60 = vector.broadcast %cst_33 : f32 to vector<16x32xf32>
    %61 = arith.maximumf %59, %60 : vector<16x32xf32>
    %c2 = arith.constant 2 : index
    %c0_34 = arith.constant 0 : index
    %c0_35 = arith.constant 0 : index
    %62 = vector.load %arg2[%c2, %c0_34, %c0_35] : memref<4x32x192xf32, #tpu.memory_space<vmem>>, vector<1x32x192xf32>
    %63 = vector.shape_cast %62 : vector<1x32x192xf32> to vector<32x192xf32>
    %cst_36 = arith.constant dense<0.000000e+00> : vector<16x192xf32>
    %64 = tpu.matmul %61, %63, %cst_36 {dimension_numbers = #tpu.dot_dimension_numbers<[1], [0], [0], [1], [0, 0, 1, 1], [], []>} : vector<16x32xf32>, vector<32x192xf32>, vector<16x192xf32> -> vector<16x192xf32>
    %c2_37 = arith.constant 2 : index
    %c0_38 = arith.constant 0 : index
    %c0_39 = arith.constant 0 : index
    %65 = vector.load %arg1[%c2_37, %c0_38, %c0_39] : memref<4x96x16xf32, #tpu.memory_space<vmem>>, vector<1x96x16xf32>
    %66 = vector.shape_cast %65 : vector<1x96x16xf32> to vector<96x16xf32>
    %cst_40 = arith.constant dense<0.000000e+00> : vector<96x192xf32>
    %67 = tpu.matmul %66, %64, %cst_40 {dimension_numbers = #tpu.dot_dimension_numbers<[1], [0], [0], [1], [0, 0, 1, 1], [], []>} : vector<96x16xf32>, vector<16x192xf32>, vector<96x192xf32> -> vector<96x192xf32>
    %68 = vector.extract_strided_slice %67 {offsets = [0, 0], sizes = [16, 32], strides = [1, 1]} : vector<96x192xf32> to vector<16x32xf32>
    %69 = vector.extract_strided_slice %67 {offsets = [16, 32], sizes = [16, 32], strides = [1, 1]} : vector<96x192xf32> to vector<16x32xf32>
    %70 = arith.addf %68, %69 : vector<16x32xf32>
    %71 = vector.extract_strided_slice %67 {offsets = [32, 64], sizes = [16, 32], strides = [1, 1]} : vector<96x192xf32> to vector<16x32xf32>
    %72 = arith.addf %70, %71 : vector<16x32xf32>
    %73 = vector.extract_strided_slice %67 {offsets = [48, 96], sizes = [16, 32], strides = [1, 1]} : vector<96x192xf32> to vector<16x32xf32>
    %74 = arith.addf %72, %73 : vector<16x32xf32>
    %75 = vector.extract_strided_slice %67 {offsets = [64, 128], sizes = [16, 32], strides = [1, 1]} : vector<96x192xf32> to vector<16x32xf32>
    %76 = arith.addf %74, %75 : vector<16x32xf32>
    %77 = vector.extract_strided_slice %67 {offsets = [80, 160], sizes = [16, 32], strides = [1, 1]} : vector<96x192xf32> to vector<16x32xf32>
    %78 = arith.addf %76, %77 : vector<16x32xf32>
    %c2_41 = arith.constant 2 : index
    %c0_42 = arith.constant 0 : index
    %c0_43 = arith.constant 0 : index
    %79 = vector.load %arg3[%c2_41, %c0_42, %c0_43] : memref<4x64x32xf32, #tpu.memory_space<vmem>>, vector<1x64x32xf32>
    %80 = vector.shape_cast %79 : vector<1x64x32xf32> to vector<64x32xf32>
    %81 = vector.extract_strided_slice %80 {offsets = [0, 0], sizes = [32, 32], strides = [1, 1]} : vector<64x32xf32> to vector<32x32xf32>
    %cst_44 = arith.constant dense<0.000000e+00> : vector<16x32xf32>
    %82 = tpu.matmul %31, %81, %cst_44 {dimension_numbers = #tpu.dot_dimension_numbers<[1], [0], [0], [1], [0, 0, 1, 1], [], []>} : vector<16x32xf32>, vector<32x32xf32>, vector<16x32xf32> -> vector<16x32xf32>
    %83 = vector.extract_strided_slice %80 {offsets = [32, 0], sizes = [32, 32], strides = [1, 1]} : vector<64x32xf32> to vector<32x32xf32>
    %cst_45 = arith.constant dense<0.000000e+00> : vector<16x32xf32>
    %84 = tpu.matmul %78, %83, %cst_45 {dimension_numbers = #tpu.dot_dimension_numbers<[1], [0], [0], [1], [0, 0, 1, 1], [], []>} : vector<16x32xf32>, vector<32x32xf32>, vector<16x32xf32> -> vector<16x32xf32>
    %85 = arith.addf %82, %84 : vector<16x32xf32>
    %c2_46 = arith.constant 2 : index
    %c0_47 = arith.constant 0 : index
    %c0_48 = arith.constant 0 : index
    %86 = vector.load %arg4[%c2_46, %c0_47, %c0_48] : memref<4x1x32xf32, #tpu.memory_space<vmem>>, vector<1x1x32xf32>
    %87 = vector.shape_cast %86 : vector<1x1x32xf32> to vector<1x32xf32>
    %88 = vector.broadcast %87 : vector<1x32xf32> to vector<16x32xf32>
    %89 = arith.addf %85, %88 : vector<16x32xf32>
    %cst_49 = arith.constant 0.000000e+00 : f32
    %90 = vector.broadcast %cst_49 : f32 to vector<16x32xf32>
    %91 = arith.maximumf %89, %90 : vector<16x32xf32>
    %c3 = arith.constant 3 : index
    %c0_50 = arith.constant 0 : index
    %c0_51 = arith.constant 0 : index
    %92 = vector.load %arg2[%c3, %c0_50, %c0_51] : memref<4x32x192xf32, #tpu.memory_space<vmem>>, vector<1x32x192xf32>
    %93 = vector.shape_cast %92 : vector<1x32x192xf32> to vector<32x192xf32>
    %cst_52 = arith.constant dense<0.000000e+00> : vector<16x192xf32>
    %94 = tpu.matmul %31, %93, %cst_52 {dimension_numbers = #tpu.dot_dimension_numbers<[1], [0], [0], [1], [0, 0, 1, 1], [], []>} : vector<16x32xf32>, vector<32x192xf32>, vector<16x192xf32> -> vector<16x192xf32>
    %c3_53 = arith.constant 3 : index
    %c0_54 = arith.constant 0 : index
    %c0_55 = arith.constant 0 : index
    %95 = vector.load %arg1[%c3_53, %c0_54, %c0_55] : memref<4x96x16xf32, #tpu.memory_space<vmem>>, vector<1x96x16xf32>
    %96 = vector.shape_cast %95 : vector<1x96x16xf32> to vector<96x16xf32>
    %cst_56 = arith.constant dense<0.000000e+00> : vector<96x192xf32>
    %97 = tpu.matmul %96, %94, %cst_56 {dimension_numbers = #tpu.dot_dimension_numbers<[1], [0], [0], [1], [0, 0, 1, 1], [], []>} : vector<96x16xf32>, vector<16x192xf32>, vector<96x192xf32> -> vector<96x192xf32>
    %98 = vector.extract_strided_slice %97 {offsets = [0, 0], sizes = [16, 32], strides = [1, 1]} : vector<96x192xf32> to vector<16x32xf32>
    %99 = vector.extract_strided_slice %97 {offsets = [16, 32], sizes = [16, 32], strides = [1, 1]} : vector<96x192xf32> to vector<16x32xf32>
    %100 = arith.addf %98, %99 : vector<16x32xf32>
    %101 = vector.extract_strided_slice %97 {offsets = [32, 64], sizes = [16, 32], strides = [1, 1]} : vector<96x192xf32> to vector<16x32xf32>
    %102 = arith.addf %100, %101 : vector<16x32xf32>
    %103 = vector.extract_strided_slice %97 {offsets = [48, 96], sizes = [16, 32], strides = [1, 1]} : vector<96x192xf32> to vector<16x32xf32>
    %104 = arith.addf %102, %103 : vector<16x32xf32>
    %105 = vector.extract_strided_slice %97 {offsets = [64, 128], sizes = [16, 32], strides = [1, 1]} : vector<96x192xf32> to vector<16x32xf32>
    %106 = arith.addf %104, %105 : vector<16x32xf32>
    %107 = vector.extract_strided_slice %97 {offsets = [80, 160], sizes = [16, 32], strides = [1, 1]} : vector<96x192xf32> to vector<16x32xf32>
    %108 = arith.addf %106, %107 : vector<16x32xf32>
    %c3_57 = arith.constant 3 : index
    %c0_58 = arith.constant 0 : index
    %c0_59 = arith.constant 0 : index
    %109 = vector.load %arg3[%c3_57, %c0_58, %c0_59] : memref<4x64x32xf32, #tpu.memory_space<vmem>>, vector<1x64x32xf32>
    %110 = vector.shape_cast %109 : vector<1x64x32xf32> to vector<64x32xf32>
    %111 = vector.extract_strided_slice %110 {offsets = [0, 0], sizes = [32, 32], strides = [1, 1]} : vector<64x32xf32> to vector<32x32xf32>
    %cst_60 = arith.constant dense<0.000000e+00> : vector<16x32xf32>
    %112 = tpu.matmul %61, %111, %cst_60 {dimension_numbers = #tpu.dot_dimension_numbers<[1], [0], [0], [1], [0, 0, 1, 1], [], []>} : vector<16x32xf32>, vector<32x32xf32>, vector<16x32xf32> -> vector<16x32xf32>
    %113 = vector.extract_strided_slice %110 {offsets = [32, 0], sizes = [32, 32], strides = [1, 1]} : vector<64x32xf32> to vector<32x32xf32>
    %cst_61 = arith.constant dense<0.000000e+00> : vector<16x32xf32>
    %114 = tpu.matmul %108, %113, %cst_61 {dimension_numbers = #tpu.dot_dimension_numbers<[1], [0], [0], [1], [0, 0, 1, 1], [], []>} : vector<16x32xf32>, vector<32x32xf32>, vector<16x32xf32> -> vector<16x32xf32>
    %115 = arith.addf %112, %114 : vector<16x32xf32>
    %c3_62 = arith.constant 3 : index
    %c0_63 = arith.constant 0 : index
    %c0_64 = arith.constant 0 : index
    %116 = vector.load %arg4[%c3_62, %c0_63, %c0_64] : memref<4x1x32xf32, #tpu.memory_space<vmem>>, vector<1x1x32xf32>
    %117 = vector.shape_cast %116 : vector<1x1x32xf32> to vector<1x32xf32>
    %118 = vector.broadcast %117 : vector<1x32xf32> to vector<16x32xf32>
    %119 = arith.addf %115, %118 : vector<16x32xf32>
    %cst_65 = arith.constant 0.000000e+00 : f32
    %120 = vector.broadcast %cst_65 : f32 to vector<16x32xf32>
    %121 = arith.maximumf %119, %120 : vector<16x32xf32>
    %c0_66 = arith.constant 0 : index
    %c0_67 = arith.constant 0 : index
    %122 = vector.load %arg5[%c0_66, %c0_67] : memref<33x64xf32, #tpu.memory_space<vmem>>, vector<33x64xf32>
    %123 = vector.extract_strided_slice %122 {offsets = [0, 0], sizes = [32, 32], strides = [1, 1]} : vector<33x64xf32> to vector<32x32xf32>
    %124 = vector.extract_strided_slice %122 {offsets = [0, 32], sizes = [32, 32], strides = [1, 1]} : vector<33x64xf32> to vector<32x32xf32>
    %125 = vector.extract_strided_slice %122 {offsets = [32, 0], sizes = [1, 32], strides = [1, 1]} : vector<33x64xf32> to vector<1x32xf32>
    %126 = vector.extract_strided_slice %122 {offsets = [32, 32], sizes = [1, 32], strides = [1, 1]} : vector<33x64xf32> to vector<1x32xf32>
    %cst_68 = arith.constant dense<0.000000e+00> : vector<16x32xf32>
    %127 = tpu.matmul %91, %123, %cst_68 {dimension_numbers = #tpu.dot_dimension_numbers<[1], [0], [0], [1], [0, 0, 1, 1], [], []>} : vector<16x32xf32>, vector<32x32xf32>, vector<16x32xf32> -> vector<16x32xf32>
    %128 = vector.broadcast %125 : vector<1x32xf32> to vector<16x32xf32>
    %129 = arith.addf %127, %128 : vector<16x32xf32>
    %c0_69 = arith.constant 0 : index
    %c0_70 = arith.constant 0 : index
    %130 = vector.load %arg6[%c0_69, %c0_70] : memref<32x32xf32, #tpu.memory_space<vmem>>, vector<16x32xf32>
    tpu.vector_store %arg6[%c0_69, %c0_70], %129 {strides = array<i32>} : memref<32x32xf32, #tpu.memory_space<vmem>>, vector<16x32xf32>,
    %cst_71 = arith.constant dense<0.000000e+00> : vector<16x32xf32>
    %131 = tpu.matmul %121, %124, %cst_71 {dimension_numbers = #tpu.dot_dimension_numbers<[1], [0], [0], [1], [0, 0, 1, 1], [], []>} : vector<16x32xf32>, vector<32x32xf32>, vector<16x32xf32> -> vector<16x32xf32>
    %132 = vector.broadcast %126 : vector<1x32xf32> to vector<16x32xf32>
    %133 = arith.addf %131, %132 : vector<16x32xf32>
    %c16_72 = arith.constant 16 : index
    %c0_73 = arith.constant 0 : index
    %134 = vector.load %arg6[%c16_72, %c0_73] : memref<32x32xf32, #tpu.memory_space<vmem>>, vector<16x32xf32>
    tpu.vector_store %arg6[%c16_72, %c0_73], %133 {strides = array<i32>} : memref<32x32xf32, #tpu.memory_space<vmem>>, vector<16x32xf32>,
    return
  }
}

</mosaic_0001>

<bundles_post_ra>
// kernel: gcmc_rating2_forward_pallas.1
= control target key start
LH: loop header
LB: loop body
LE: loop exit
PB: predicated region body
PF: predicated region fallthrough
CT: control target
= control target key end

     0   :  { %vm35_vm0 = vcmask 261120   ;;  %vm100_vm1 = vcmask 130048   ;;  %s1626_s17 = smov 96   ;;  %s1627_s8 = smov 64   ;;  %s2299_s2 = inlined_call_operand.vmem [shape: f32[4,32,192], index: 2, kind: input, shape index: {}]   ;;  %s2300_s0 = inlined_call_operand.vmem [shape: f32[32,32], index: 0, kind: input, shape index: {}]   ;;  %s2301_s1 = inlined_call_operand.vmem [shape: f32[4,96,16], index: 1, kind: input, shape index: {}]   ;;  %s2302_s3 = inlined_call_operand.vmem [shape: f32[4,64,32], index: 3, kind: input, shape index: {}]   ;;  %s2303_s4 = inlined_call_operand.vmem [shape: f32[4,1,32], index: 4, kind: input, shape index: {}]   ;;  %s2304_s5 = inlined_call_operand.vmem [shape: f32[33,64], index: 5, kind: input, shape index: {}]   ;;  %s2305_s6 = inlined_call_operand.vmem [shape: f32[32,32], index: 6, kind: output, shape index: {}]  }
   0x1   :  { %v33_v0 = vld [vmem:[%s2299_s2 + $0x30] sm:$0xff]  ;;  %v34_v1 = vld [vmem:[%s2299_s2 + $0x38] sm:$0xff]  ;;  %v31_v2 = vld [vmem:[%s2299_s2 + $0x20] sm:$0xff]  ;;  %s1628_s14 = smov 32  }
   0x2   :  { %1600 = vmatpush.msra.mxu2 %v33_v0  ;;  %1604 = vmatpush.msra.mxu3 %v34_v1  ;;  %v32_v3 = vld [vmem:[%s2299_s2 + $0x28] sm:$0xff]  ;;  %v29_v4 = vld [vmem:[%s2299_s2 + $0x10] sm:$0xff]  ;;  %v30_v5 = vld [vmem:[%s2299_s2 + $0x18] sm:$0xff] }
   0x3   :  { %54 = vmatpush.msra.mxu0 %v33_v0  ;;  %77 = vmatpush.msra.mxu1 %v34_v1  ;;  %v27_v6 = vld [vmem:[%s2299_s2] sm:$0xff]  ;;  %v28_v7 = vld [vmem:[%s2299_s2 + $0x8] sm:$0xff]  ;;  %v1691_v8 = vld [vmem:[%s2300_s0 + $0x18] sm:$0xff] }
   0x4   :  { %1601 = vmatpush.msra.mxu2 %v31_v2  ;;  %1605 = vmatpush.msra.mxu3 %v32_v3  ;;  %v1696_v9 = vld [vmem:[%s2300_s0 + $0x10] sm:$0xff]  ;;  %v88_v14 = vld [vmem:[%s2301_s1] sm:$0xff]  ;;  %v89_v15 = vld [vmem:[%s2301_s1 + $0x8] sm:$0xff] }
   0x5   :  { %55 = vmatpush.msra.mxu0 %v31_v2  ;;  %78 = vmatpush.msra.mxu1 %v32_v3  ;;  %v90_v16 = vld [vmem:[%s2301_s1 + $0x10] sm:$0xff]  ;;  %v91_v17 = vld [vmem:[%s2301_s1 + $0x18] sm:$0xff]  ;;  %v92_v18 = vld [vmem:[%s2301_s1 + $0x20] sm:$0xff] }
   0x6   :  { %1602 = vmatpush.msra.mxu2 %v29_v4  ;;  %1606 = vmatpush.msra.mxu3 %v30_v5  ;;  %v93_v19 = vld [vmem:[%s2301_s1 + $0x28] sm:$0xff]  ;;  %v94_v20 = vld [vmem:[%s2301_s1 + $0x30] sm:$0xff]  ;;  %v95_v21 = vld [vmem:[%s2301_s1 + $0x38] sm:$0xff] }
   0x7   :  { %56 = vmatpush.msra.mxu0 %v29_v4  ;;  %79 = vmatpush.msra.mxu1 %v30_v5  ;;  %v96_v22 = vld [vmem:[%s2301_s1 + $0x40] sm:$0xff]  ;;  %v97_v23 = vld [vmem:[%s2301_s1 + $0x48] sm:$0xff]  ;;  %v98_v24 = vld [vmem:[%s2301_s1 + $0x50] sm:$0xff] }
   0x8   :  { %1603 = vmatpush.msra.mxu2 %v27_v6  ;;  %1607 = vmatpush.msra.mxu3 %v28_v7  ;;  %v99_v25 = vld [vmem:[%s2301_s1 + $0x58] sm:$0xff]  ;;  %v275_v33 = vld [vmem:[%s2302_s3 + $0x10] sm:$0xff]  ;;  %v274_v34 = vld [vmem:[%s2302_s3 + $0x8] sm:$0xff] }
   0x9   :  { %1382 = vmatmul.msk.f32.vlgmr.msra.gmra.mxu2 %vm35_vm0, %v1691_v8  ;;  %1384 = vmatmul.msk.f32.vlgmr.msra.gmra.mxu3 %vm35_vm0, %v1691_v8  ;;  %v276_v32 = vld [vmem:[%s2302_s3 + $0x18] sm:$0xff]  ;;  %v273_v35 = vld [vmem:[%s2302_s3] sm:$0xff]  ;;  %v1793_v41 = vld [vmem:[%s2300_s0 + $0x8] sm:$0xff] }
   0xa   :  { %57 = vmatpush.msra.mxu0 %v27_v6  ;;  %80 = vmatpush.msra.mxu1 %v28_v7  ;;  %v1786_v38 = vld [vmem:[%s2300_s0] sm:$0xff]  ;;  %v1420_v42 = vld [vmem:[%s2299_s2 + $0x78] sm:$0xff]  ;;  %v1418_v43 = vld [vmem:[%s2299_s2 + $0x68] sm:$0xff] }
   0xb   :  { %1381 = vmatmul.msk.f32.vlgmr.msra.gmra.mxu0 %vm35_vm0, %v1696_v9  ;;  %1383 = vmatmul.msk.f32.vlgmr.msra.gmra.mxu1 %vm35_vm0, %v1696_v9  ;;  %v1416_v44 = vld [vmem:[%s2299_s2 + $0x58] sm:$0xff]  ;;  %v1414_v45 = vld [vmem:[%s2299_s2 + $0x48] sm:$0xff]  ;;  %v279_v61 = vld [vmem:[%s2302_s3 + $0x30] sm:$0xff] }
   0xc   :  { %328 = vmatpush.msrb.mxu1 %v276_v32  ;;  %v280_v60 = vld [vmem:[%s2302_s3 + $0x38] sm:$0xff]  ;;  %v278_v62 = vld [vmem:[%s2302_s3 + $0x28] sm:$0xff]  ;;  %v277_v63 = vld [vmem:[%s2302_s3 + $0x20] sm:$0xff] }
   0xd   :  { %299 = vmatpush.msrb.mxu0 %v280_v60 }
   0xe   :  { %329 = vmatpush.msrb.mxu1 %v275_v33  ;;  %v1430_v33 = vld [vmem:[%s2301_s1 + $0x88] sm:$0xff] }
   0xf   :  { %300 = vmatpush.msrb.mxu0 %v279_v61 }
  0x10   :  { %330 = vmatpush.msrb.mxu1 %v274_v34  ;;  %v1431_v34 = vld [vmem:[%s2301_s1 + $0x90] sm:$0xff] }
  0x11   :  { %301 = vmatpush.msrb.mxu0 %v278_v62 }
  0x12   :  { %331 = vmatpush.msrb.mxu1 %v273_v35  ;;  %v1432_v35 = vld [vmem:[%s2301_s1 + $0x98] sm:$0xff] }
  0x13   :  { %1411 = vmatmul.msk.f32.vlgmr.msrb.gmra.mxu1 %vm35_vm0, %v1786_v38  ;;  %302 = vmatpush.msrb.mxu0 %v277_v63 }
  0x14   :  { %391 = vmatpush.msra.mxu1 %v1420_v42  ;;  %v1523_v42 = vld [vmem:[%s2302_s3 + $0x88] sm:$0xff] }
  0x16   :  { %392 = vmatpush.msra.mxu1 %v1418_v43  ;;  %v1522_v43 = vld [vmem:[%s2302_s3 + $0x80] sm:$0xff] }
  0x18   :  { %393 = vmatpush.msra.mxu1 %v1416_v44  ;;  %v1621_v44 = vld [vmem:[%s2303_s4] ss:$0 sm:$0xff] }
  0x1a   :  { %394 = vmatpush.msra.mxu1 %v1414_v45 }
  0x1b   :  { %1412 = vmatmul.msk.f32.gmra.mxu1 %vm35_vm0, %v1793_v41 }
  0x23   :  { %1423 = vmatmul.msk.f32.vlgmr.msra.gmra.mxu1 %vm35_vm0, %v1786_v38 }
  0x2b   :  { %1424 = vmatmul.msk.f32.gmra.mxu1 %vm35_vm0, %v1793_v41 }
  0x88   :  { %v59_v10 = vpop.f32.mrf.mxu0  ;;  %v82_v11 = vpop.f32.mrf.mxu1 }
  0x8c   :  { %v62_v12 = vpop.f32.mrf.mxu2  ;;  %v85_v13 = vpop.f32.mrf.mxu3 }
  0x8d   :  { %151 = vmatpush.msrb.mxu2 %v62_v12  ;;  %200 = vmatpush.msrb.mxu3 %v85_v13 }
  0x8f   :  { %152 = vmatpush.msrb.mxu2 %v59_v10  ;;  %201 = vmatpush.msrb.mxu3 %v82_v11 }
  0x90   :  { %1385 = vmatmul.msk.f32.vlgmr.msrb.gmra.mxu2 %vm100_vm1, %v88_v14  ;;  %1397 = vmatmul.msk.f32.vlgmr.msrb.gmra.mxu3 %vm100_vm1, %v88_v14  ;;  %v1832_v0 = vpop.f32.mrf.mxu1 }
  0x98   :  { %1386 = vmatmul.msk.f32.gmra.mxu2 %vm100_vm1, %v89_v15  ;;  %1398 = vmatmul.msk.f32.gmra.mxu3 %vm100_vm1, %v89_v15  ;;  %v1834_v2 = vpop.f32.mrf.mxu1  ;;  %v1419_v15 = vld [vmem:[%s2299_s2 + $0x70] sm:$0xff] }
  0x99   :  { %368 = vmatpush.msra.mxu0 %v1419_v15 }
  0xa0   :  { %1387 = vmatmul.msk.f32.gmra.mxu2 %vm100_vm1, %v90_v16  ;;  %1399 = vmatmul.msk.f32.gmra.mxu3 %vm100_vm1, %v90_v16  ;;  %v396_v10 = vpop.f32.mrf.mxu1  ;;  %v1417_v16 = vld [vmem:[%s2299_s2 + $0x60] sm:$0xff] }
  0xa1   :  { %369 = vmatpush.msra.mxu0 %v1417_v16 }
  0xa8   :  { %1388 = vmatmul.msk.f32.gmra.mxu2 %vm100_vm1, %v91_v17  ;;  %1400 = vmatmul.msk.f32.gmra.mxu3 %vm100_vm1, %v91_v17  ;;  %v399_v14 = vpop.f32.mrf.mxu1  ;;  %v1847_v17 = vld [vmem:[%s2301_s1 + $0x60] sm:$0xff] }
  0xa9   :  { %514 = vmatpush.msrb.mxu1 %v399_v14 }
  0xab   :  { %515 = vmatpush.msrb.mxu1 %v396_v10 }
  0xac   :  { %1449 = vmatmul.msk.f32.vlgmr.msrb.gmra.mxu1 %vm100_vm1, %v1847_v17 }
  0xb0   :  { %1389 = vmatmul.msk.f32.gmra.mxu2 %vm100_vm1, %v92_v18  ;;  %1401 = vmatmul.msk.f32.gmra.mxu3 %vm100_vm1, %v92_v18  ;;  %v1415_v18 = vld [vmem:[%s2299_s2 + $0x50] sm:$0xff] }
  0xb1   :  { %370 = vmatpush.msra.mxu0 %v1415_v18  ;;  %v1464_v18 = vld [vmem:[%s2302_s3 + $0x58] sm:$0xff] }
  0xb2   :  { %637 = vmatpush.msra.mxu3 %v1464_v18  ;;  %v1490_v18 = vld [vmem:[%s2301_s1 + $0xe0] sm:$0xff] }
  0xb8   :  { %1390 = vmatmul.msk.f32.gmra.mxu2 %vm100_vm1, %v93_v19  ;;  %1402 = vmatmul.msk.f32.gmra.mxu3 %vm100_vm1, %v93_v19  ;;  %v1413_v19 = vld [vmem:[%s2299_s2 + $0x40] sm:$0xff] }
  0xb9   :  { %371 = vmatpush.msra.mxu0 %v1413_v19 }
  0xc0   :  { %1391 = vmatmul.msk.f32.gmra.mxu2 %vm100_vm1, %v94_v20  ;;  %1403 = vmatmul.msk.f32.gmra.mxu3 %vm100_vm1, %v94_v20  ;;  %v1860_v20 = vld [vmem:[%s2301_s1 + $0x68] sm:$0xff] }
  0xc1   :  { %1450 = vmatmul.msk.f32.gmra.mxu1 %vm100_vm1, %v1860_v20 }
  0xc8   :  { %1404 = vmatmul.msk.f32.gmra.mxu3 %vm100_vm1, %v95_v21  ;;  %1392 = vmatmul.msk.f32.gmra.mxu2 %vm100_vm1, %v95_v21 }
  0xd0   :  { %1405 = vmatmul.msk.f32.gmra.mxu3 %vm100_vm1, %v96_v22  ;;  %1393 = vmatmul.msk.f32.gmra.mxu2 %vm100_vm1, %v96_v22 }
  0xd8   :  { %1406 = vmatmul.msk.f32.gmra.mxu3 %vm100_vm1, %v97_v23  ;;  %1394 = vmatmul.msk.f32.gmra.mxu2 %vm100_vm1, %v97_v23  ;;  %v1867_v23 = vld [vmem:[%s2301_s1 + $0x70] sm:$0xff] }
  0xd9   :  { %1451 = vmatmul.msk.f32.gmra.mxu1 %vm100_vm1, %v1867_v23 }
  0xe0   :  { %1407 = vmatmul.msk.f32.gmra.mxu3 %vm100_vm1, %v98_v24  ;;  %1395 = vmatmul.msk.f32.gmra.mxu2 %vm100_vm1, %v98_v24 }
  0xe8   :  { %1408 = vmatmul.msk.f32.gmra.mxu3 %vm100_vm1, %v99_v25  ;;  %1396 = vmatmul.msk.f32.gmra.mxu2 %vm100_vm1, %v99_v25 }
 0x113   :  { %v1766_v26 = vpop.f32.mrf.mxu2  ;;  %v203_v27 = vpop.f32.mrf.mxu3 }
 0x11b   :  { %v1768_v28 = vpop.f32.mrf.mxu2  ;;  %v205_v29 = vpop.f32.mrf.mxu3 }
 0x11c   :  { %v1875_v29 = vld [vmem:[%s2301_s1 + $0x78] sm:$0xff] }
 0x11d   :  { %1452 = vmatmul.msk.f32.gmra.mxu1 %vm100_vm1, %v1875_v29 }
 0x123   :  { %v160_v30 = vpop.f32.mrf.mxu2  ;;  %v207_v31 = vpop.f32.mrf.mxu3 }
 0x124   :  { %233 = vrot.lane.b32.xlu0 %v160_v30, %s1626_s17 }
 0x12b   :  { %v163_v36 = vpop.f32.mrf.mxu2  ;;  %v209_v37 = vpop.f32.mrf.mxu3 }
 0x12c   :  { %v1434_v37 = vld [vmem:[%s2301_s1 + $0xa8] sm:$0xff] }
 0x133   :  { %v166_v39 = vpop.f32.mrf.mxu2  ;;  %v211_v40 = vpop.f32.mrf.mxu3 }
 0x134   :  { %243 = vrot.lane.b32.xlu0 %v166_v39, %s1627_s8  ;;  %v1436_v39 = vld [vmem:[%s2301_s1 + $0xb8] sm:$0xff] }
 0x135   :  { %v1525_v40 = vld [vmem:[%s2302_s3 + $0x98] sm:$0xff] }
 0x136   :  { %959 = vmatpush.msra.mxu1 %v1525_v40 }
 0x13b   :  { %v169_v46 = vpop.f32.mrf.mxu2  ;;  %v213_v47 = vpop.f32.mrf.mxu3 }
 0x143   :  { %v172_v48 = vpop.f32.mrf.mxu2  ;;  %v215_v49 = vpop.f32.mrf.mxu3 }
 0x144   :  { %253 = vrot.lane.b32.xlu1 %v172_v48, %s1628_s14  ;;  %v517_v48 = vpop.f32.mrf.mxu1 }
 0x14b   :  { %v217_v50 = vpop.f32.mrf.mxu3  ;;  %v175_v51 = vpop.f32.mrf.mxu2 }
 0x14c   :  { %235 = vrot.lane.b32.xlu1 %v163_v36, %s1626_s17  ;;  %255 = vrot.lane.b32.xlu0 %v175_v51, %s1628_s14  ;;  %v1433_v36 = vld [vmem:[%s2301_s1 + $0xa0] sm:$0xff]  ;;  %v1542_v50 = vld [vmem:[%s2299_s2 + $0xf8] sm:$0xff] }
 0x14d   :  { %v1540_v51 = vld [vmem:[%s2299_s2 + $0xe8] sm:$0xff] }
 0x153   :  { %v219_v52 = vpop.f32.mrf.mxu3  ;;  %v178_v53 = vpop.f32.mrf.mxu2 }
 0x154   :  { %v1536_v53 = vld [vmem:[%s2299_s2 + $0xc8] sm:$0xff] }
 0x15b   :  { %v222_v54 = vpop.f32.mrf.mxu3  ;;  %v180_v55 = vpop.f32.mrf.mxu2 }
 0x163   :  { %v225_v56 = vpop.f32.mrf.mxu3  ;;  %v182_v57 = vpop.f32.mrf.mxu2 }
 0x164   :  { %265 = vrot.lane.b32.xlu2 %v225_v56, %s1626_s17 }
 0x16b   :  { %v228_v58 = vpop.f32.mrf.mxu3  ;;  %v184_v59 = vpop.f32.mrf.mxu2 }
 0x16c   :  { %245 = vrot.lane.b32.xlu2 %v169_v46, %s1627_s8  ;;  %267 = vrot.lane.b32.xlu1 %v228_v58, %s1626_s17 }
 0x196   :  { %v234_v1 = vpop.permute.xlu0 %233 }
 0x197   :  { %v239_v4 = vadd.f32 %v234_v1, %v1766_v26 }
 0x1a6   :  { %v244_v3 = vpop.permute.xlu0 %243 }
 0x1a7   :  { %v249_v6 = vadd.f32 %v244_v3, %v239_v4 }
 0x1b6   :  { %v254_v5 = vpop.permute.xlu1 %253 }
 0x1b7   :  { %v259_v7 = vadd.f32 %v254_v5, %v249_v6 }
 0x1b9   :  { %v261_v11 = vadd.f32 %v259_v7, %v219_v52  ;;  %v1538_v52 = vld [vmem:[%s2299_s2 + $0xd8] sm:$0xff] }
 0x1be   :  { %v266_v12 = vpop.permute.xlu2 %265  ;;  %v236_v21 = vpop.permute.xlu1 %235 }
 0x1bf   :  { %v271_v13 = vadd.f32 %v266_v12, %v261_v11  ;;  %v240_v24 = vadd.f32 %v236_v21, %v1768_v28  ;;  %v256_v26 = vpop.permute.xlu0 %255  ;;  %v1883_v28 = vld [vmem:[%s2301_s1 + $0x80] sm:$0xff] }
 0x1c0   :  { %1453 = vmatmul.msk.f32.gmra.mxu1 %vm100_vm1, %v1883_v28 }
 0x1c1   :  { %1409 = vmatmul.msk.f32.vlgmr.msrb.gmra.mxu0 %vm35_vm0, %v271_v13 }
 0x1c6   :  { %v246_v22 = vpop.permute.xlu2 %245 }
 0x1c7   :  { %v250_v25 = vadd.f32 %v246_v22, %v240_v24 }
 0x1c8   :  { %1454 = vmatmul.msk.f32.gmra.mxu1 %vm100_vm1, %v1430_v33 }
 0x1c9   :  { %v260_v27 = vadd.f32 %v256_v26, %v250_v25  ;;  %v1467_v25 = vld [vmem:[%s2302_s3 + $0x70] sm:$0xff] }
 0x1ca   :  { %v1463_v26 = vld [vmem:[%s2302_s3 + $0x50] sm:$0xff] }
 0x1cb   :  { %v262_v30 = vadd.f32 %v260_v27, %v222_v54  ;;  %v519_v54 = vpop.f32.mrf.mxu1  ;;  %638 = vmatpush.msra.mxu3 %v1463_v26  ;;  %v1494_v26 = vld [vmem:[%s2301_s1 + $0x100] sm:$0xff] }
 0x1cc   :  { %v1476_v54 = vld [vmem:[%s2299_s2 + $0x90] sm:$0xff] }
 0x1d0   :  { %1455 = vmatmul.msk.f32.gmra.mxu1 %vm100_vm1, %v1431_v34 }
 0x1d3   :  { %v521_v55 = vpop.f32.mrf.mxu1 }
 0x1d4   :  { %v1477_v55 = vld [vmem:[%s2299_s2 + $0x98] sm:$0xff] }
 0x1d8   :  { %1456 = vmatmul.msk.f32.gmra.mxu1 %vm100_vm1, %v1432_v35 }
 0x1db   :  { %v523_v56 = vpop.f32.mrf.mxu1 }
 0x1dc   :  { %v1474_v56 = vld [vmem:[%s2299_s2 + $0x80] sm:$0xff] }
 0x1de   :  { %v268_v31 = vpop.permute.xlu1 %267 }
 0x1df   :  { %v272_v32 = vadd.f32 %v268_v31, %v262_v30  ;;  %v1462_v30 = vld [vmem:[%s2302_s3 + $0x48] sm:$0xff] }
 0x1e0   :  { %1457 = vmatmul.msk.f32.gmra.mxu1 %vm100_vm1, %v1433_v36  ;;  %639 = vmatpush.msra.mxu3 %v1462_v30  ;;  %v1497_v30 = vld [vmem:[%s2301_s1 + $0x118] sm:$0xff] }
 0x1e1   :  { %1410 = vmatmul.msk.f32.gmra.mxu0 %vm35_vm0, %v272_v32  ;;  %v1465_v32 = vld [vmem:[%s2302_s3 + $0x60] sm:$0xff] }
 0x1e8   :  { %1458 = vmatmul.msk.f32.gmra.mxu1 %vm100_vm1, %v1434_v37 }
 0x1e9   :  { %1421 = vmatmul.msk.f32.vlgmr.msra.gmra.mxu0 %vm35_vm0, %v1786_v38  ;;  %v1435_v38 = vld [vmem:[%s2301_s1 + $0xb0] sm:$0xff] }
 0x1f0   :  { %1459 = vmatmul.msk.f32.gmra.mxu1 %vm100_vm1, %v1435_v38 }
 0x1f1   :  { %1422 = vmatmul.msk.f32.gmra.mxu0 %vm35_vm0, %v1793_v41  ;;  %v1524_v41 = vld [vmem:[%s2302_s3 + $0x90] sm:$0xff] }
 0x1f2   :  { %960 = vmatpush.msra.mxu1 %v1524_v41 }
 0x1f4   :  { %961 = vmatpush.msra.mxu1 %v1523_v42 }
 0x1f6   :  { %962 = vmatpush.msra.mxu1 %v1522_v43 }
 0x1f8   :  { %1460 = vmatmul.msk.f32.gmra.mxu1 %vm100_vm1, %v1436_v39 }
 0x1f9   :  { %1023 = vmatpush.msrb.mxu1 %v1542_v50  ;;  %v1480_v50 = vld [vmem:[%s2299_s2 + $0xb0] sm:$0xff] }
 0x1fb   :  { %1024 = vmatpush.msrb.mxu1 %v1540_v51  ;;  %v1481_v51 = vld [vmem:[%s2299_s2 + $0xb8] sm:$0xff] }
 0x1fd   :  { %1025 = vmatpush.msrb.mxu1 %v1538_v52  ;;  %v1478_v52 = vld [vmem:[%s2299_s2 + $0xa0] sm:$0xff] }
 0x1ff   :  { %1026 = vmatpush.msrb.mxu1 %v1536_v53  ;;  %v1479_v53 = vld [vmem:[%s2299_s2 + $0xa8] sm:$0xff] }
 0x23d   :  { %v525_v60 = vpop.f32.mrf.mxu1 }
 0x23e   :  { %v304_v45 = vpop.f32.mrf.mxu0 }
 0x23f   :  { %v334_v46 = vadd.f32 %v1832_v0, %v304_v45 }
 0x241   :  { %v343_v47 = vadd.f32 %v1621_v44, %v334_v46 }
 0x243   :  { %v1935_v49 = vmax.f32 %v343_v47, 0.0 }
 0x245   :  { %1532 = vmatmul.msk.f32.vlgmr.msra.gmra.mxu1 %vm35_vm0, %v1935_v49  ;;  %v527_v63 = vpop.f32.mrf.mxu1 }
 0x24d   :  { %v529_v1 = vpop.f32.mrf.mxu1 }
 0x25e   :  { %v307_v57 = vpop.f32.mrf.mxu0 }
 0x25f   :  { %v337_v58 = vadd.f32 %v1834_v2, %v307_v57  ;;  %v531_v2 = vpop.f32.mrf.mxu1  ;;  %v1475_v57 = vld [vmem:[%s2299_s2 + $0x88] sm:$0xff] }
 0x261   :  { %v344_v59 = vadd.f32 %v1621_v44, %v337_v58 }
 0x263   :  { %v1952_v61 = vmax.f32 %v344_v59, 0.0  ;;  %v1622_v59 = vld [vmem:[%s2303_s4 + $0x1] ss:$0 sm:$0xff] }
 0x265   :  { %1533 = vmatmul.msk.f32.gmra.mxu1 %vm35_vm0, %v1952_v61 }
 0x266   :  { %v373_v62 = vpop.f32.mrf.mxu0 }
 0x267   :  { %v533_v3 = vpop.f32.mrf.mxu1 }
 0x26d   :  { %1545 = vmatmul.msk.f32.vlgmr.msrb.gmra.mxu1 %vm35_vm0, %v1935_v49 }
 0x26e   :  { %v376_v0 = vpop.f32.mrf.mxu0 }
 0x26f   :  { %465 = vmatpush.msrb.mxu0 %v376_v0  ;;  %v1975_v4 = vpop.f32.mrf.mxu1 }
 0x271   :  { %466 = vmatpush.msrb.mxu0 %v373_v62 }
 0x272   :  { %1437 = vmatmul.msk.f32.vlgmr.msrb.gmra.mxu0 %vm100_vm1, %v1847_v17  ;;  %v1468_v17 = vld [vmem:[%s2302_s3 + $0x78] sm:$0xff] }
 0x273   :  { %614 = vmatpush.msra.mxu2 %v1468_v17  ;;  %v1489_v17 = vld [vmem:[%s2301_s1 + $0xd8] sm:$0xff] }
 0x275   :  { %1546 = vmatmul.msk.f32.gmra.mxu1 %vm35_vm0, %v1952_v61  ;;  %615 = vmatpush.msra.mxu2 %v1467_v25  ;;  %v1583_v25 = vld [vmem:[%s2302_s3 + $0xc0] sm:$0xff] }
 0x277   :  { %v539_v5 = vpop.f32.mrf.mxu1 }
 0x27a   :  { %1438 = vmatmul.msk.f32.gmra.mxu0 %vm100_vm1, %v1860_v20 }
 0x27f   :  { %v542_v6 = vpop.f32.mrf.mxu1 }
 0x282   :  { %1439 = vmatmul.msk.f32.gmra.mxu0 %vm100_vm1, %v1867_v23 }
 0x28a   :  { %1440 = vmatmul.msk.f32.gmra.mxu0 %vm100_vm1, %v1875_v29  ;;  %v1466_v29 = vld [vmem:[%s2302_s3 + $0x68] sm:$0xff] }
 0x28b   :  { %616 = vmatpush.msra.mxu2 %v1466_v29  ;;  %v1496_v29 = vld [vmem:[%s2301_s1 + $0x110] sm:$0xff] }
 0x28d   :  { %617 = vmatpush.msra.mxu2 %v1465_v32 }
 0x28f   :  { %684 = vmatpush.msrb.mxu2 %v1480_v50 }
 0x291   :  { %685 = vmatpush.msrb.mxu2 %v1478_v52 }
 0x292   :  { %1441 = vmatmul.msk.f32.gmra.mxu0 %vm100_vm1, %v1883_v28  ;;  %v1461_v28 = vld [vmem:[%s2302_s3 + $0x40] sm:$0xff] }
 0x293   :  { %640 = vmatpush.msra.mxu3 %v1461_v28  ;;  %686 = vmatpush.msrb.mxu2 %v1476_v54 }
 0x294   :  { %1471 = vmatmul.msk.f32.vlgmr.msra.gmra.mxu3 %vm35_vm0, %v1696_v9 }
 0x295   :  { %707 = vmatpush.msrb.mxu3 %v1481_v51  ;;  %687 = vmatpush.msrb.mxu2 %v1474_v56  ;;  %v1526_v56 = vld [vmem:[%s2302_s3 + $0xa0] sm:$0xff] }
 0x297   :  { %708 = vmatpush.msrb.mxu3 %v1479_v53 }
 0x299   :  { %709 = vmatpush.msrb.mxu3 %v1477_v55  ;;  %v1527_v55 = vld [vmem:[%s2302_s3 + $0xa8] sm:$0xff] }
 0x29a   :  { %1442 = vmatmul.msk.f32.gmra.mxu0 %vm100_vm1, %v1430_v33 }
 0x29b   :  { %710 = vmatpush.msrb.mxu3 %v1475_v57  ;;  %v1541_v57 = vld [vmem:[%s2299_s2 + $0xf0] sm:$0xff] }
 0x29c   :  { %1472 = vmatmul.msk.f32.gmra.mxu3 %vm35_vm0, %v1691_v8 }
 0x2a2   :  { %1443 = vmatmul.msk.f32.gmra.mxu0 %vm100_vm1, %v1431_v34 }
 0x2aa   :  { %1444 = vmatmul.msk.f32.gmra.mxu0 %vm100_vm1, %v1432_v35 }
 0x2b2   :  { %1445 = vmatmul.msk.f32.gmra.mxu0 %vm100_vm1, %v1433_v36 }
 0x2ba   :  { %1446 = vmatmul.msk.f32.gmra.mxu0 %vm100_vm1, %v1434_v37 }
 0x2c2   :  { %1447 = vmatmul.msk.f32.gmra.mxu0 %vm100_vm1, %v1435_v38  ;;  %v1979_v7 = vpop.f32.mrf.mxu1 }
 0x2ca   :  { %1448 = vmatmul.msk.f32.gmra.mxu0 %vm100_vm1, %v1436_v39 }
 0x2e2   :  { %v1981_v10 = vpop.f32.mrf.mxu1 }
 0x2ea   :  { %v1028_v11 = vpop.f32.mrf.mxu1 }
 0x2ef   :  { %v468_v12 = vpop.f32.mrf.mxu0 }
 0x2f2   :  { %v1031_v13 = vpop.f32.mrf.mxu1 }
 0x2f3   :  { %1146 = vmatpush.msra.mxu1 %v1031_v13 }
 0x2f5   :  { %1147 = vmatpush.msra.mxu1 %v1028_v11 }
 0x2f7   :  { %v471_v14 = vpop.f32.mrf.mxu0 }
 0x2ff   :  { %v474_v15 = vpop.f32.mrf.mxu0 }
 0x300   :  { %547 = vrot.lane.b32.xlu2 %v474_v15, %s1626_s17  ;;  %v1487_v15 = vld [vmem:[%s2301_s1 + $0xc8] sm:$0xff] }
 0x307   :  { %v477_v16 = vpop.f32.mrf.mxu0 }
 0x308   :  { %549 = vrot.lane.b32.xlu2 %v477_v16, %s1626_s17  ;;  %v1488_v16 = vld [vmem:[%s2301_s1 + $0xd0] sm:$0xff] }
 0x30f   :  { %v480_v19 = vpop.f32.mrf.mxu0 }
 0x310   :  { %557 = vrot.lane.b32.xlu0 %v480_v19, %s1627_s8  ;;  %v1491_v19 = vld [vmem:[%s2301_s1 + $0xe8] sm:$0xff] }
 0x317   :  { %v483_v20 = vpop.f32.mrf.mxu0  ;;  %v642_v58 = vpop.f32.mrf.mxu3 }
 0x318   :  { %579 = vrot.lane.b32.xlu0 %v539_v5, %s1626_s17 }
 0x31f   :  { %v486_v21 = vpop.f32.mrf.mxu0  ;;  %v645_v1 = vpop.f32.mrf.mxu3 }
 0x320   :  { %567 = vrot.lane.b32.xlu1 %v486_v21, %s1628_s14  ;;  %581 = vrot.lane.b32.xlu0 %v542_v6, %s1626_s17  ;;  %v1493_v21 = vld [vmem:[%s2301_s1 + $0xf8] sm:$0xff] }
 0x327   :  { %v489_v22 = vpop.f32.mrf.mxu0 }
 0x328   :  { %559 = vrot.lane.b32.xlu1 %v483_v20, %s1627_s8  ;;  %569 = vrot.lane.b32.xlu2 %v489_v22, %s1628_s14  ;;  %v1492_v20 = vld [vmem:[%s2301_s1 + $0xf0] sm:$0xff]  ;;  %v1586_v22 = vld [vmem:[%s2302_s3 + $0xd8] sm:$0xff] }
 0x32f   :  { %v492_v23 = vpop.f32.mrf.mxu0 }
 0x330   :  { %v1585_v23 = vld [vmem:[%s2302_s3 + $0xd0] sm:$0xff] }
 0x337   :  { %v494_v24 = vpop.f32.mrf.mxu0 }
 0x338   :  { %v1584_v24 = vld [vmem:[%s2302_s3 + $0xc8] sm:$0xff] }
 0x33f   :  { %v496_v27 = vpop.f32.mrf.mxu0 }
 0x340   :  { %v1495_v27 = vld [vmem:[%s2301_s1 + $0x108] sm:$0xff] }
 0x347   :  { %v498_v31 = vpop.f32.mrf.mxu0 }
 0x35a   :  { %v548_v33 = vpop.permute.xlu2 %547 }
 0x35b   :  { %v553_v35 = vadd.f32 %v548_v33, %v468_v12 }
 0x362   :  { %v550_v37 = vpop.permute.xlu2 %549 }
 0x363   :  { %v554_v43 = vadd.f32 %v550_v37, %v471_v14  ;;  %v1486_v14 = vld [vmem:[%s2301_s1 + $0xc0] sm:$0xff] }
 0x382   :  { %v558_v34 = vpop.permute.xlu0 %557  ;;  %v570_v45 = vpop.permute.xlu2 %569 }
 0x383   :  { %v563_v36 = vadd.f32 %v558_v34, %v553_v35 }
 0x38a   :  { %v580_v40 = vpop.permute.xlu0 %579 }
 0x392   :  { %v568_v38 = vpop.permute.xlu1 %567  ;;  %v582_v47 = vpop.permute.xlu0 %581 }
 0x393   :  { %v573_v39 = vadd.f32 %v568_v38, %v563_v36 }
 0x395   :  { %v575_v41 = vadd.f32 %v573_v39, %v533_v3 }
 0x397   :  { %v585_v42 = vadd.f32 %v580_v40, %v575_v41 }
 0x399   :  { %1469 = vmatmul.msk.f32.vlgmr.msra.gmra.mxu2 %vm35_vm0, %v585_v42 }
 0x39a   :  { %v560_v44 = vpop.permute.xlu1 %559 }
 0x39b   :  { %v564_v46 = vadd.f32 %v560_v44, %v554_v43 }
 0x39d   :  { %v574_v9 = vadd.f32 %v570_v45, %v564_v46  ;;  %v1529_v46 = vld [vmem:[%s2302_s3 + $0xb8] sm:$0xff] }
 0x39e   :  { %930 = vmatpush.msra.mxu0 %v1529_v46 }
 0x39f   :  { %v576_v8 = vadd.f32 %v574_v9, %v1975_v4 }
 0x3a1   :  { %v586_v48 = vadd.f32 %v582_v47, %v576_v8 }
 0x3a3   :  { %1470 = vmatmul.msk.f32.gmra.mxu2 %vm35_vm0, %v586_v48  ;;  %v1528_v48 = vld [vmem:[%s2302_s3 + $0xb0] sm:$0xff] }
 0x3a4   :  { %931 = vmatpush.msra.mxu0 %v1528_v48 }
 0x3a6   :  { %932 = vmatpush.msra.mxu0 %v1527_v55 }
 0x3a8   :  { %933 = vmatpush.msra.mxu0 %v1526_v56 }
 0x3aa   :  { %1000 = vmatpush.msrb.mxu0 %v1541_v57 }
 0x41c   :  { %v619_v60 = vpop.f32.mrf.mxu2 }
 0x41d   :  { %v643_v62 = vadd.f32 %v642_v58, %v619_v60  ;;  %v1539_v58 = vld [vmem:[%s2299_s2 + $0xe0] sm:$0xff] }
 0x41e   :  { %1001 = vmatpush.msrb.mxu0 %v1539_v58 }
 0x41f   :  { %v653_v63 = vadd.f32 %v1622_v59, %v643_v62  ;;  %v1535_v62 = vld [vmem:[%s2299_s2 + $0xc0] sm:$0xff] }
 0x421   :  { %v655_v0 = vmax.f32 %v653_v63, 0.0 }
 0x423   :  { %1482 = vmatmul.msk.f32.vlgmr.msrb.gmra.mxu2 %vm35_vm0, %v655_v0  ;;  %1484 = vmatmul.msk.f32.vlgmr.msrb.gmra.mxu3 %vm35_vm0, %v655_v0 }
 0x426   :  { %v622_v2 = vpop.f32.mrf.mxu2 }
 0x427   :  { %v646_v3 = vadd.f32 %v645_v1, %v622_v2 }
 0x429   :  { %v654_v4 = vadd.f32 %v1622_v59, %v646_v3  ;;  %v1537_v59 = vld [vmem:[%s2299_s2 + $0xd0] sm:$0xff] }
 0x42a   :  { %1002 = vmatpush.msrb.mxu0 %v1537_v59  ;;  %v1588_v59 = vld [vmem:[%s2302_s3 + $0xe8] sm:$0xff] }
 0x42b   :  { %v656_v5 = vmax.f32 %v654_v4, 0.0 }
 0x42c   :  { %1003 = vmatpush.msrb.mxu0 %v1535_v62  ;;  %v1289_v62 = vld [vmem:[%s2304_s5] sm:$0xff] }
 0x42d   :  { %1483 = vmatmul.msk.f32.gmra.mxu2 %vm35_vm0, %v656_v5  ;;  %1485 = vmatmul.msk.f32.gmra.mxu3 %vm35_vm0, %v656_v5 }
 0x4a6   :  { %v689_v6 = vpop.f32.mrf.mxu2  ;;  %v712_v11 = vpop.f32.mrf.mxu3 }
 0x4b0   :  { %v692_v12 = vpop.f32.mrf.mxu2  ;;  %v715_v13 = vpop.f32.mrf.mxu3 }
 0x4b1   :  { %781 = vmatpush.msra.mxu2 %v692_v12  ;;  %830 = vmatpush.msra.mxu3 %v715_v13 }
 0x4b3   :  { %782 = vmatpush.msra.mxu2 %v689_v6  ;;  %831 = vmatpush.msra.mxu3 %v712_v11 }
 0x4b4   :  { %1498 = vmatmul.msk.f32.vlgmr.msra.gmra.mxu2 %vm100_vm1, %v1486_v14  ;;  %1510 = vmatmul.msk.f32.vlgmr.msra.gmra.mxu3 %vm100_vm1, %v1486_v14 }
 0x4b5   :  { %1269 = vmatpush.msrb.mxu3 %v1586_v22  ;;  %v1549_v22 = vld [vmem:[%s2301_s1 + $0x130] sm:$0xff] }
 0x4b7   :  { %1270 = vmatpush.msrb.mxu3 %v1585_v23  ;;  %v1550_v23 = vld [vmem:[%s2301_s1 + $0x138] sm:$0xff] }
 0x4b9   :  { %1271 = vmatpush.msrb.mxu3 %v1584_v24  ;;  %v1551_v24 = vld [vmem:[%s2301_s1 + $0x140] sm:$0xff] }
 0x4bb   :  { %1272 = vmatpush.msrb.mxu3 %v1583_v25 }
 0x4bc   :  { %1499 = vmatmul.msk.f32.gmra.mxu2 %vm100_vm1, %v1487_v15  ;;  %1511 = vmatmul.msk.f32.gmra.mxu3 %vm100_vm1, %v1487_v15 }
 0x4c4   :  { %1500 = vmatmul.msk.f32.gmra.mxu2 %vm100_vm1, %v1488_v16  ;;  %1512 = vmatmul.msk.f32.gmra.mxu3 %vm100_vm1, %v1488_v16 }
 0x4cc   :  { %1501 = vmatmul.msk.f32.gmra.mxu2 %vm100_vm1, %v1489_v17  ;;  %1513 = vmatmul.msk.f32.gmra.mxu3 %vm100_vm1, %v1489_v17  ;;  %v1548_v17 = vld [vmem:[%s2301_s1 + $0x128] sm:$0xff] }
 0x4d4   :  { %1502 = vmatmul.msk.f32.gmra.mxu2 %vm100_vm1, %v1490_v18  ;;  %1514 = vmatmul.msk.f32.gmra.mxu3 %vm100_vm1, %v1490_v18 }
 0x4dc   :  { %1503 = vmatmul.msk.f32.gmra.mxu2 %vm100_vm1, %v1491_v19  ;;  %1515 = vmatmul.msk.f32.gmra.mxu3 %vm100_vm1, %v1491_v19 }
 0x4e4   :  { %1504 = vmatmul.msk.f32.gmra.mxu2 %vm100_vm1, %v1492_v20  ;;  %1516 = vmatmul.msk.f32.gmra.mxu3 %vm100_vm1, %v1492_v20 }
 0x4ec   :  { %1517 = vmatmul.msk.f32.gmra.mxu3 %vm100_vm1, %v1493_v21  ;;  %1505 = vmatmul.msk.f32.gmra.mxu2 %vm100_vm1, %v1493_v21 }
 0x4f4   :  { %1518 = vmatmul.msk.f32.gmra.mxu3 %vm100_vm1, %v1494_v26  ;;  %1506 = vmatmul.msk.f32.gmra.mxu2 %vm100_vm1, %v1494_v26 }
 0x4fc   :  { %1519 = vmatmul.msk.f32.gmra.mxu3 %vm100_vm1, %v1495_v27  ;;  %1507 = vmatmul.msk.f32.gmra.mxu2 %vm100_vm1, %v1495_v27  ;;  %v1553_v27 = vld [vmem:[%s2301_s1 + $0x150] sm:$0xff] }
 0x504   :  { %1520 = vmatmul.msk.f32.gmra.mxu3 %vm100_vm1, %v1496_v29  ;;  %1508 = vmatmul.msk.f32.gmra.mxu2 %vm100_vm1, %v1496_v29 }
 0x50c   :  { %1521 = vmatmul.msk.f32.gmra.mxu3 %vm100_vm1, %v1497_v30  ;;  %1509 = vmatmul.msk.f32.gmra.mxu2 %vm100_vm1, %v1497_v30  ;;  %v1554_v30 = vld [vmem:[%s2301_s1 + $0x158] sm:$0xff] }
 0x514   :  { %1593 = vmatmul.msk.f32.vlgmr.msrb.gmra.mxu3 %vm35_vm0, %v655_v0 }
 0x51c   :  { %1594 = vmatmul.msk.f32.gmra.mxu3 %vm35_vm0, %v656_v5  ;;  %v1547_v5 = vld [vmem:[%s2301_s1 + $0x120] sm:$0xff] }
 0x51d   :  { %1571 = vmatmul.msk.f32.vlgmr.msra.gmra.mxu1 %vm100_vm1, %v1547_v5 }
 0x525   :  { %1572 = vmatmul.msk.f32.gmra.mxu1 %vm100_vm1, %v1548_v17 }
 0x52d   :  { %1573 = vmatmul.msk.f32.gmra.mxu1 %vm100_vm1, %v1549_v22 }
 0x535   :  { %1574 = vmatmul.msk.f32.gmra.mxu1 %vm100_vm1, %v1550_v23 }
 0x537   :  { %v784_v31 = vpop.f32.mrf.mxu2  ;;  %v833_v32 = vpop.f32.mrf.mxu3 }
 0x538   :  { %v1555_v32 = vld [vmem:[%s2301_s1 + $0x160] sm:$0xff] }
 0x53d   :  { %1575 = vmatmul.msk.f32.gmra.mxu1 %vm100_vm1, %v1551_v24 }
 0x53f   :  { %v787_v28 = vpop.f32.mrf.mxu2  ;;  %v835_v33 = vpop.f32.mrf.mxu3 }
 0x540   :  { %v1556_v33 = vld [vmem:[%s2301_s1 + $0x168] sm:$0xff] }
 0x547   :  { %v790_v34 = vpop.f32.mrf.mxu2  ;;  %v837_v35 = vpop.f32.mrf.mxu3 }
 0x548   :  { %863 = vrot.lane.b32.xlu1 %v790_v34, %s1626_s17  ;;  %v1557_v34 = vld [vmem:[%s2301_s1 + $0x170] sm:$0xff]  ;;  %v1558_v35 = vld [vmem:[%s2301_s1 + $0x178] sm:$0xff] }
 0x54f   :  { %v793_v36 = vpop.f32.mrf.mxu2  ;;  %v839_v37 = vpop.f32.mrf.mxu3 }
 0x550   :  { %865 = vrot.lane.b32.xlu1 %v793_v36, %s1626_s17 }
 0x557   :  { %v796_v38 = vpop.f32.mrf.mxu2  ;;  %v841_v39 = vpop.f32.mrf.mxu3 }
 0x558   :  { %873 = vrot.lane.b32.xlu2 %v796_v38, %s1627_s8 }
 0x55f   :  { %v799_v40 = vpop.f32.mrf.mxu2  ;;  %v843_v41 = vpop.f32.mrf.mxu3 }
 0x567   :  { %v802_v42 = vpop.f32.mrf.mxu2  ;;  %v845_v43 = vpop.f32.mrf.mxu3 }
 0x568   :  { %883 = vrot.lane.b32.xlu0 %v802_v42, %s1628_s14 }
 0x56f   :  { %v847_v44 = vpop.f32.mrf.mxu3  ;;  %v805_v45 = vpop.f32.mrf.mxu2 }
 0x570   :  { %875 = vrot.lane.b32.xlu0 %v799_v40, %s1627_s8  ;;  %885 = vrot.lane.b32.xlu1 %v805_v45, %s1628_s14 }
 0x577   :  { %v849_v9 = vpop.f32.mrf.mxu3  ;;  %v808_v47 = vpop.f32.mrf.mxu2 }
 0x578   :  { %v1589_v47 = vld [vmem:[%s2302_s3 + $0xf0] sm:$0xff] }
 0x57f   :  { %v852_v8 = vpop.f32.mrf.mxu3  ;;  %v810_v50 = vpop.f32.mrf.mxu2 }
 0x587   :  { %v855_v51 = vpop.f32.mrf.mxu3  ;;  %v812_v52 = vpop.f32.mrf.mxu2 }
 0x588   :  { %895 = vrot.lane.b32.xlu2 %v855_v51, %s1626_s17 }
 0x58f   :  { %v858_v53 = vpop.f32.mrf.mxu3  ;;  %v814_v54 = vpop.f32.mrf.mxu2 }
 0x590   :  { %897 = vrot.lane.b32.xlu2 %v858_v53, %s1626_s17 }
 0x5b2   :  { %v874_v0 = vpop.permute.xlu2 %873 }
 0x5ba   :  { %v864_v60 = vpop.permute.xlu1 %863 }
 0x5bb   :  { %v869_v63 = vadd.f32 %v864_v60, %v784_v31  ;;  %v1587_v60 = vld [vmem:[%s2302_s3 + $0xe0] sm:$0xff] }
 0x5bd   :  { %v879_v3 = vadd.f32 %v874_v0, %v869_v63  ;;  %v1290_v63 = vld [vmem:[%s2304_s5 + $0x8] sm:$0xff] }
 0x5be   :  { %v1616_v0 = vpack.i.bf16 %v1289_v62, %v1290_v63 }
 0x5c2   :  { %v866_v2 = vpop.permute.xlu1 %865 }
 0x5c3   :  { %v870_v6 = vadd.f32 %v866_v2, %v787_v28 }
 0x5da   :  { %v884_v1 = vpop.permute.xlu0 %883 }
 0x5db   :  { %v889_v4 = vadd.f32 %v884_v1, %v879_v3  ;;  %v1292_v3 = vld [vmem:[%s2304_s5 + $0x18] sm:$0xff] }
 0x5dd   :  { %v891_v11 = vadd.f32 %v889_v4, %v849_v9  ;;  %v1590_v9 = vld [vmem:[%s2302_s3 + $0xf8] sm:$0xff]  ;;  %v1291_v4 = vld [vmem:[%s2304_s5 + $0x10] sm:$0xff] }
 0x5de   :  { %1246 = vmatpush.msrb.mxu2 %v1590_v9 }
 0x5e0   :  { %1247 = vmatpush.msrb.mxu2 %v1589_v47 }
 0x5e2   :  { %v896_v12 = vpop.permute.xlu2 %895  ;;  %v876_v13 = vpop.permute.xlu0 %875  ;;  %1248 = vmatpush.msrb.mxu2 %v1588_v59 }
 0x5e3   :  { %v901_v14 = vadd.f32 %v896_v12, %v891_v11  ;;  %v880_v15 = vadd.f32 %v876_v13, %v870_v6  ;;  %v886_v16 = vpop.permute.xlu1 %885  ;;  %v1611_v6 = vpack.i.bf16 %v1291_v4, %v1292_v3 }
 0x5e4   :  { %1249 = vmatpush.msrb.mxu2 %v1587_v60 }
 0x5e5   :  { %v890_v18 = vadd.f32 %v886_v16, %v880_v15  ;;  %1530 = vmatmul.msk.f32.vlgmr.msra.gmra.mxu0 %vm35_vm0, %v901_v14 }
 0x5e6   :  { %1313 = vmatpush.msra.mxu2 %v1292_v3 }
 0x5e7   :  { %v892_v19 = vadd.f32 %v890_v18, %v852_v8 }
 0x5e8   :  { %1314 = vmatpush.msra.mxu2 %v1291_v4 }
 0x5ea   :  { %v898_v20 = vpop.permute.xlu2 %897  ;;  %1315 = vmatpush.msra.mxu2 %v1290_v63 }
 0x5eb   :  { %v902_v21 = vadd.f32 %v898_v20, %v892_v19 }
 0x5ec   :  { %1316 = vmatpush.msra.mxu2 %v1289_v62 }
 0x5ed   :  { %1531 = vmatmul.msk.f32.gmra.mxu0 %vm35_vm0, %v902_v21 }
 0x5f5   :  { %1543 = vmatmul.msk.f32.vlgmr.msrb.gmra.mxu0 %vm35_vm0, %v1935_v49  ;;  %v1149_v49 = vpop.f32.mrf.mxu1 }
 0x5fd   :  { %1544 = vmatmul.msk.f32.gmra.mxu0 %vm35_vm0, %v1952_v61  ;;  %v1552_v61 = vld [vmem:[%s2301_s1 + $0x148] sm:$0xff]  ;;  %v1151_v26 = vpop.f32.mrf.mxu1 }
 0x5fe   :  { %1576 = vmatmul.msk.f32.gmra.mxu1 %vm100_vm1, %v1552_v61 }
 0x605   :  { %v1153_v36 = vpop.f32.mrf.mxu1 }
 0x606   :  { %1577 = vmatmul.msk.f32.gmra.mxu1 %vm100_vm1, %v1553_v27 }
 0x60d   :  { %v1155_v37 = vpop.f32.mrf.mxu1 }
 0x60e   :  { %1578 = vmatmul.msk.f32.gmra.mxu1 %vm100_vm1, %v1554_v30  ;;  %v1274_v37 = vpop.f32.mrf.mxu3 }
 0x615   :  { %v1157_v38 = vpop.f32.mrf.mxu1 }
 0x616   :  { %1579 = vmatmul.msk.f32.gmra.mxu1 %vm100_vm1, %v1555_v32 }
 0x61e   :  { %1580 = vmatmul.msk.f32.gmra.mxu1 %vm100_vm1, %v1556_v33 }
 0x626   :  { %1581 = vmatmul.msk.f32.gmra.mxu1 %vm100_vm1, %v1557_v34 }
 0x62e   :  { %1582 = vmatmul.msk.f32.gmra.mxu1 %vm100_vm1, %v1558_v35 }
 0x662   :  { %v2189_v25 = vpop.f32.mrf.mxu0 }
 0x663   :  { %v965_v49 = vadd.f32 %v1979_v7, %v2189_v25 }
 0x66a   :  { %v2195_v29 = vpop.f32.mrf.mxu0 }
 0x672   :  { %v1005_v31 = vpop.f32.mrf.mxu0 }
 0x67a   :  { %v1008_v28 = vpop.f32.mrf.mxu0 }
 0x67b   :  { %1097 = vmatpush.msra.mxu0 %v1008_v28  ;;  %v1159_v39 = vpop.f32.mrf.mxu1 }
 0x67d   :  { %1098 = vmatpush.msra.mxu0 %v1005_v31  ;;  %v968_v31 = vadd.f32 %v1981_v10, %v2195_v29  ;;  %v1625_v10 = vld [vmem:[%s2304_s5 + $0x20] ss:$0 sm:$0xff]  ;;  %v1624_v29 = vld [vmem:[%s2303_s4 + $0x3] ss:$0 sm:$0xff] }
 0x67e   :  { %1559 = vmatmul.msk.f32.vlgmr.msra.gmra.mxu0 %vm100_vm1, %v1547_v5 }
 0x683   :  { %v1161_v40 = vpop.f32.mrf.mxu1 }
 0x686   :  { %1560 = vmatmul.msk.f32.gmra.mxu0 %vm100_vm1, %v1548_v17 }
 0x68b   :  { %v1163_v41 = vpop.f32.mrf.mxu1 }
 0x68e   :  { %1561 = vmatmul.msk.f32.gmra.mxu0 %vm100_vm1, %v1549_v22 }
 0x693   :  { %v1165_v45 = vpop.f32.mrf.mxu1 }
 0x696   :  { %1562 = vmatmul.msk.f32.gmra.mxu0 %vm100_vm1, %v1550_v23 }
 0x69b   :  { %v1168_v8 = vpop.f32.mrf.mxu1 }
 0x69e   :  { %1563 = vmatmul.msk.f32.gmra.mxu0 %vm100_vm1, %v1551_v24 }
 0x6a3   :  { %v1171_v50 = vpop.f32.mrf.mxu1 }
 0x6a6   :  { %1564 = vmatmul.msk.f32.gmra.mxu0 %vm100_vm1, %v1552_v61  ;;  %v1623_v61 = vld [vmem:[%s2303_s4 + $0x2] ss:$0 sm:$0xff] }
 0x6ab   :  { %v1174_v52 = vpop.f32.mrf.mxu1 }
 0x6ae   :  { %1565 = vmatmul.msk.f32.gmra.mxu0 %vm100_vm1, %v1553_v27  ;;  %v975_v27 = vadd.f32 %v1623_v61, %v965_v49 }
 0x6b6   :  { %1566 = vmatmul.msk.f32.gmra.mxu0 %vm100_vm1, %v1554_v30  ;;  %v977_v30 = vmax.f32 %v975_v27, 0.0 }
 0x6be   :  { %1567 = vmatmul.msk.f32.gmra.mxu0 %vm100_vm1, %v1555_v32  ;;  %v976_v32 = vadd.f32 %v1623_v61, %v968_v31 }
 0x6c0   :  { %v978_v28 = vmax.f32 %v976_v32, 0.0 }
 0x6c6   :  { %1568 = vmatmul.msk.f32.gmra.mxu0 %vm100_vm1, %v1556_v33 }
 0x6ce   :  { %1569 = vmatmul.msk.f32.gmra.mxu0 %vm100_vm1, %v1557_v34 }
 0x6d6   :  { %1570 = vmatmul.msk.f32.gmra.mxu0 %vm100_vm1, %v1558_v35 }
 0x6fb   :  { %v1100_v42 = vpop.f32.mrf.mxu0 }
 0x703   :  { %v1103_v43 = vpop.f32.mrf.mxu0 }
 0x70b   :  { %v1106_v44 = vpop.f32.mrf.mxu0 }
 0x70c   :  { %1179 = vrot.lane.b32.xlu0 %v1106_v44, %s1626_s17 }
 0x713   :  { %v1109_v46 = vpop.f32.mrf.mxu0 }
 0x714   :  { %1181 = vrot.lane.b32.xlu0 %v1109_v46, %s1626_s17 }
 0x71b   :  { %v1112_v48 = vpop.f32.mrf.mxu0 }
 0x71c   :  { %1189 = vrot.lane.b32.xlu1 %v1112_v48, %s1627_s8 }
 0x723   :  { %v1115_v51 = vpop.f32.mrf.mxu0 }
 0x724   :  { %1211 = vrot.lane.b32.xlu1 %v1171_v50, %s1626_s17 }
 0x72b   :  { %v1118_v53 = vpop.f32.mrf.mxu0 }
 0x72c   :  { %1199 = vrot.lane.b32.xlu2 %v1118_v53, %s1628_s14  ;;  %1213 = vrot.lane.b32.xlu1 %v1174_v52, %s1626_s17 }
 0x733   :  { %v1121_v54 = vpop.f32.mrf.mxu0 }
 0x734   :  { %1191 = vrot.lane.b32.xlu2 %v1115_v51, %s1627_s8  ;;  %1201 = vrot.lane.b32.xlu0 %v1121_v54, %s1628_s14 }
 0x735   :  { %1343 = vrot.lane.b32.xlu1 %v1625_v10, %s1626_s17 }
 0x73b   :  { %v1124_v55 = vpop.f32.mrf.mxu0 }
 0x73c   :  { %1617 = vrot.lane.b32.xlu0 %v1616_v0, %s1626_s17  ;;  %1612 = vrot.lane.b32.xlu2 %v1611_v6, %s1626_s17 }
 0x743   :  { %v1126_v56 = vpop.f32.mrf.mxu0 }
 0x74b   :  { %v1128_v57 = vpop.f32.mrf.mxu0 }
 0x753   :  { %v1130_v58 = vpop.f32.mrf.mxu0 }
 0x77e   :  { %v1180_v1 = vpop.permute.xlu0 %1179 }
 0x77f   :  { %v1185_v2 = vadd.f32 %v1180_v1, %v1100_v42  ;;  %v1277_v42 = vpop.f32.mrf.mxu3 }
 0x786   :  { %v1200_v12 = vpop.permute.xlu2 %1199  ;;  %v1182_v17 = vpop.permute.xlu0 %1181 }
 0x787   :  { %v1186_v19 = vadd.f32 %v1182_v17, %v1103_v43 }
 0x78e   :  { %v1190_v5 = vpop.permute.xlu1 %1189  ;;  %v1192_v18 = vpop.permute.xlu2 %1191 }
 0x78f   :  { %v1195_v11 = vadd.f32 %v1190_v5, %v1185_v2  ;;  %v1196_v20 = vadd.f32 %v1192_v18, %v1186_v19 }
 0x791   :  { %v1205_v13 = vadd.f32 %v1200_v12, %v1195_v11 }
 0x793   :  { %v1207_v14 = vadd.f32 %v1205_v13, %v1165_v45 }
 0x796   :  { %v1212_v15 = vpop.permute.xlu1 %1211  ;;  %v1613_v33 = vpop.permute.xlu2 %1612 }
 0x797   :  { %v1217_v16 = vadd.f32 %v1212_v15, %v1207_v14  ;;  %v1615_v7 = vunpack.i.h.bf16 %v1613_v33  ;;  %v1614_v25 = vunpack.i.l.bf16 %v1613_v33 }
 0x799   :  { %1591 = vmatmul.msk.f32.vlgmr.msrb.gmra.mxu2 %vm35_vm0, %v1217_v16  ;;  %1364 = vmatpush.msra.mxu3 %v1614_v25 }
 0x79b   :  { %1365 = vmatpush.msra.mxu3 %v1615_v7 }
 0x79e   :  { %v1214_v23 = vpop.permute.xlu1 %1213 }
 0x7a6   :  { %v1202_v21 = vpop.permute.xlu0 %1201 }
 0x7a7   :  { %v1206_v22 = vadd.f32 %v1202_v21, %v1196_v20  ;;  %v1344_v50 = vpop.permute.xlu1 %1343 }
 0x7a9   :  { %v1208_v24 = vadd.f32 %v1206_v22, %v1168_v8 }
 0x7ab   :  { %v1218_v26 = vadd.f32 %v1214_v23, %v1208_v24 }
 0x7ad   :  { %1592 = vmatmul.msk.f32.gmra.mxu2 %vm35_vm0, %v1218_v26 }
 0x7ae   :  { %v1618_v34 = vpop.permute.xlu0 %1617 }
 0x7af   :  { %v1619_v35 = vunpack.i.l.bf16 %v1618_v34  ;;  %v1620_v36 = vunpack.i.h.bf16 %v1618_v34 }
 0x7b1   :  { %1366 = vmatpush.msra.mxu3 %v1619_v35 }
 0x7b3   :  { %1367 = vmatpush.msra.mxu3 %v1620_v36 }
 0x7b5   :  { %1596 = vmatmul.msk.f32.vlgmr.msra.gmra.mxu2 %vm35_vm0, %v977_v30 }
 0x7bd   :  { %1597 = vmatmul.msk.f32.gmra.mxu2 %vm35_vm0, %v978_v28 }
 0x81c   :  { %v1251_v38 = vpop.f32.mrf.mxu2 }
 0x81d   :  { %v1275_v39 = vadd.f32 %v1274_v37, %v1251_v38 }
 0x81f   :  { %v1285_v40 = vadd.f32 %v1624_v29, %v1275_v39 }
 0x821   :  { %v1287_v41 = vmax.f32 %v1285_v40, 0.0 }
 0x823   :  { %1598 = vmatmul.msk.f32.vlgmr.msra.gmra.mxu3 %vm35_vm0, %v1287_v41 }
 0x830   :  { %v1254_v43 = vpop.f32.mrf.mxu2 }
 0x831   :  { %v1278_v44 = vadd.f32 %v1277_v42, %v1254_v43 }
 0x833   :  { %v1286_v45 = vadd.f32 %v1624_v29, %v1278_v44 }
 0x835   :  { %v1288_v46 = vmax.f32 %v1286_v45, 0.0 }
 0x837   :  { %1599 = vmatmul.msk.f32.gmra.mxu3 %vm35_vm0, %v1288_v46 }
 0x838   :  { %v1318_v9 = vpop.f32.mrf.mxu2 }
 0x839   :  { %v1319_v47 = vadd.f32 %v1625_v10, %v1318_v9 }
 0x83b   :  { %1324 = vst.msk [vmem:[%s2305_s6] sm:$0xff] %vm35_vm0, %v1319_v47 }
 0x840   :  { %v1321_v8 = vpop.f32.mrf.mxu2 }
 0x841   :  { %v1322_v48 = vadd.f32 %v1625_v10, %v1321_v8 }
 0x843   :  { %1325 = vst.msk [vmem:[%s2305_s6 + $0x8] sm:$0xff] %vm35_vm0, %v1322_v48 }
 0x8a6   :  { %v1369_v51 = vpop.f32.mrf.mxu3 }
 0x8a7   :  { %v1370_v52 = vadd.f32 %v1369_v51, %v1344_v50 }
 0x8a9   :  { %1375 = vst.msk [vmem:[%s2305_s6 + $0x10] sm:$0xff] %vm35_vm0, %v1370_v52 }
 0x8ba   :  { %v1372_v53 = vpop.f32.mrf.mxu3 }
 0x8bb   :  { %v1373_v54 = vadd.f32 %v1372_v53, %v1344_v50 }
 0x8bd   :  { %1376 = vst.msk [vmem:[%s2305_s6 + $0x18] sm:$0xff] %vm35_vm0, %v1373_v54 }

</bundles_post_ra>
